<compile_context>
chip_gen: v5e
topology: v5e:2x2
jax: 0.10.0
libtpu: 0.0.40
codegen_flags: <defaults>
</compile_context>

<pallas_src>
import math
from functools import partial

import jax
import jax.numpy as jnp
from jax.experimental import pallas as pl
from jax.experimental.pallas import tpu as pltpu

EMB_DIM = 128
HALF = EMB_DIM // 2
HIDDEN = (256, 256, 256)
OUT_PAD = 128          # lane-dense padded width for the action/eps output
MAX_PERIOD = 10000.0


# ----------------------------------------------------------------------------- kernel math
def _mish(x):
    # Mish(x) = x * tanh(softplus(x));  tanh(softplus(x)) = e(e+2)/(e(e+2)+2), e = exp(x).
    # Clamp before exp so e*(e+2) cannot overflow f32 (mish(x) ~= x for x > ~20 anyway).
    e = jnp.exp(jnp.minimum(x, 30.0))
    n = e * (e + 2.0)
    return x * (n * pl.reciprocal(n + 2.0, approx=True))


def _freq_row():
    # (1, 64) row of DDPM sinusoidal frequencies, computed in-kernel (EUP, negligible).
    k = jax.lax.broadcasted_iota(jnp.int32, (1, HALF), 1).astype(jnp.float32)
    return jnp.exp((-math.log(MAX_PERIOD) / HALF) * k)


def _bf16_dot(x, w_ref):
    # bf16 operands on the MXU, f32 accumulation.
    return jnp.dot(x.astype(jnp.bfloat16), w_ref[...],
                   preferred_element_type=jnp.float32)


def _eps_mlp(a, s, cosv, sinv,
             w1a_ref, w1s_ref, w1c_ref, w1n_ref, b1_ref,
             w2_ref, b2_ref, w3_ref, b3_ref, w4_ref, b4_ref):
    """eps_net MLP.  x @ W1 is computed as a@W1a + s@W1s + cos@W1c + sin@W1n
    (row-split of W1), which fuses the concat into the matmul."""
    h = (_bf16_dot(a, w1a_ref) + _bf16_dot(s, w1s_ref)
         + _bf16_dot(cosv, w1c_ref) + _bf16_dot(sinv, w1n_ref) + b1_ref[...])
    h = _mish(h)
    h = _mish(_bf16_dot(h, w2_ref) + b2_ref[...])
    h = _mish(_bf16_dot(h, w3_ref) + b3_ref[...])
    return _bf16_dot(h, w4_ref) + b4_ref[...]          # (B, OUT_PAD), pad cols are zero


# ----------------------------------------------------------------------------- forward kernel
def eps_net_kernel(a_ref, s_ref, t_ref,
                   w1a_ref, w1s_ref, w1c_ref, w1n_ref, b1_ref,
                   w2_ref, b2_ref, w3_ref, b3_ref, w4_ref, b4_ref,
                   o_ref):
    args = t_ref[...] * _freq_row()                    # (B, 64)
    cosv = jnp.cos(args)
    sinv = jnp.sin(args)
    o_ref[...] = _eps_mlp(a_ref[...], s_ref[...], cosv, sinv,
                          w1a_ref, w1s_ref, w1c_ref, w1n_ref, b1_ref,
                          w2_ref, b2_ref, w3_ref, b3_ref, w4_ref, b4_ref)


@partial(jax.jit, static_argnames=("a_dim",))
def diffusion_policy_forward(a_t, s, t, weights, *, a_dim):
    """Equivalent of DiffusionPolicy.forward(a_t, s, t)."""
    B = a_t.shape[0]
    t2 = t.astype(jnp.float32).reshape(B, 1)
    vmem = pl.BlockSpec(memory_space=pltpu.MemorySpace.VMEM)
    out = pl.pallas_call(
        eps_net_kernel,
        out_shape=jax.ShapeDtypeStruct((B, OUT_PAD), jnp.float32),
        in_specs=[vmem] * (3 + len(weights)),
        out_specs=vmem,
    )(a_t.astype(jnp.float32), s.astype(jnp.float32), t2, *weights)
    return out[:, :a_dim]


# ----------------------------------------------------------------------------- fused sampler
def sample_kernel(coef_ref,                             # SMEM (3, N): c_eps / c_mean / c_noise
                  s_ref, a0_ref, noise_ref,
                  w1a_ref, w1s_ref, w1c_ref, w1n_ref, b1_ref,
                  w2_ref, b2_ref, w3_ref, b3_ref, w4_ref, b4_ref,
                  a_ref):                               # output block, resident accumulator
    g = pl.program_id(0)
    n = pl.num_programs(0)

    @pl.when(g == 0)
    def _():
        a_ref[...] = a0_ref[...]

    B = s_ref.shape[0]
    t_f = (n - g).astype(jnp.float32)                   # DDPM step i = N - g
    args = t_f * _freq_row()                            # (1, 64)
    cosv = jnp.broadcast_to(jnp.cos(args), (B, HALF))
    sinv = jnp.broadcast_to(jnp.sin(args), (B, HALF))

    a_cur = a_ref[...]                                  # (B, OUT_PAD), pad cols stay zero
    eps = _eps_mlp(a_cur, s_ref[...], cosv, sinv,
                   w1a_ref, w1s_ref, w1c_ref, w1n_ref, b1_ref,
                   w2_ref, b2_ref, w3_ref, b3_ref, w4_ref, b4_ref)

    idx = n - 1 - g                                     # schedule index i-1
    c_eps = coef_ref[0, idx]                            # beta / sqrt(1 - alpha_bar)
    c_mean = coef_ref[1, idx]                           # 1 / sqrt(alpha)
    c_noise = coef_ref[2, idx]                          # sqrt(beta), 0 at the last step
    a_ref[...] = (a_cur - c_eps * eps) * c_mean + c_noise * noise_ref[0]


@partial(jax.jit, static_argnames=("a_dim",))
def diffusion_policy_sample(s, a_init, noise_seq, schedule, weights, *, a_dim):
    """Equivalent of DiffusionPolicy.sample(s) with the noise draws given explicitly.
    All N reverse-diffusion steps run inside one pallas_call; weights are DMA'd once."""
    # TODO(synk): in-kernel pltpu.prng_* could generate the per-step noise instead of the
    # precomputed noise_seq input (kept external here for exact parity with the reference).
    B, N = s.shape[0], noise_seq.shape[0]
    beta, alpha, alpha_bar = schedule["beta"], schedule["alpha"], schedule["alpha_bar"]
    c_eps = beta / jnp.sqrt(1.0 - alpha_bar)
    c_mean = 1.0 / jnp.sqrt(alpha)
    c_noise = jnp.sqrt(beta).at[0].set(0.0)             # i == 1 (idx 0): no noise
    coef = jnp.stack([c_eps, c_mean, c_noise]).astype(jnp.float32)   # (3, N)

    a0 = jnp.zeros((B, OUT_PAD), jnp.float32).at[:, :a_dim].set(a_init)
    noise_p = jnp.zeros((N, B, OUT_PAD), jnp.float32).at[:, :, :a_dim].set(noise_seq)

    def const_spec(x):                                   # whole array, resident across steps
        nd = x.ndim
        return pl.BlockSpec(x.shape, lambda g, c, _nd=nd: (0,) * _nd)

    in_specs = ([const_spec(s), const_spec(a0),
                 pl.BlockSpec((1, B, OUT_PAD), lambda g, c: (g, 0, 0))]
                + [const_spec(w) for w in weights])

    out = pl.pallas_call(
        sample_kernel,
        out_shape=jax.ShapeDtypeStruct((B, OUT_PAD), jnp.float32),
        grid_spec=pltpu.PrefetchScalarGridSpec(
            num_scalar_prefetch=1,
            grid=(N,),
            in_specs=in_specs,
            out_specs=pl.BlockSpec((B, OUT_PAD), lambda g, c: (0, 0)),
        ),
        compiler_params=pltpu.CompilerParams(dimension_semantics=("arbitrary",)),
    )(coef, s.astype(jnp.float32), a0, noise_p, *weights)
    return out[:, :a_dim]


# ----------------------------------------------------------------------------- params / schedule
def init_params(key, state_dim, action_dim):
    """Deterministic nn.Linear-style uniform init; weights stored (in, out)."""
    inp = state_dim + action_dim + EMB_DIM
    dims = [inp, *HIDDEN, action_dim]
    params = []
    for i in range(len(dims) - 1):
        key, wk, bk = jax.random.split(key, 3)
        bound = 1.0 / math.sqrt(dims[i])
        w = jax.random.uniform(wk, (dims[i], dims[i + 1]), jnp.float32, -bound, bound)
        b = jax.random.uniform(bk, (1, dims[i + 1]), jnp.float32, -bound, bound)
        params += [w, b]
    return params


def prepare_params(params, state_dim, action_dim):
    """One-time prep: split W1 rows by concat segment ([a | s | cos | sin]),
    zero-pad the output layer to 128 lanes, cast weights to bf16 (biases stay f32)."""
    w1, b1, w2, b2, w3, b3, w4, b4 = params
    A, S = action_dim, state_dim
    bf = jnp.bfloat16
    w1a = w1[:A]
    w1s = w1[A:A + S]
    w1c = w1[A + S:A + S + HALF]
    w1n = w1[A + S + HALF:A + S + EMB_DIM]
    w1a_p = jnp.zeros((OUT_PAD, w1.shape[1]), jnp.float32).at[:A].set(w1a)   # sampler carries a padded `a`
    w4_p = jnp.zeros((w4.shape[0], OUT_PAD), jnp.float32).at[:, :A].set(w4)
    b4_p = jnp.zeros((1, OUT_PAD), jnp.float32).at[:, :A].set(b4)

    fwd = (w1a.astype(bf), w1s.astype(bf), w1c.astype(bf), w1n.astype(bf), b1,
           w2.astype(bf), b2, w3.astype(bf), b3, w4_p.astype(bf), b4_p)
    smp = (w1a_p.astype(bf), w1s.astype(bf), w1c.astype(bf), w1n.astype(bf), b1,
           w2.astype(bf), b2, w3.astype(bf), b3, w4_p.astype(bf), b4_p)
    return {"a_dim": action_dim, "fwd": fwd, "smp": smp}


def make_schedule(N=30, beta_min=0.1, beta_max=10.0):
    i = jnp.arange(1, N + 1, dtype=jnp.float32)
    beta = 1.0 - jnp.exp(-beta_min / N - 0.5 * (beta_max - beta_min) * (2 * i - 1) / N ** 2)
    alpha = 1.0 - beta
    alpha_bar = jnp.cumprod(alpha)
    return {"beta": beta, "alpha": alpha, "alpha_bar": alpha_bar}


# ----------------------------------------------------------------------------- pure-JAX reference
def timestep_embedding(t, dim=EMB_DIM, max_period=10000):
    half = dim // 2
    freq = jnp.exp(-math.log(max_period) * jnp.arange(half, dtype=jnp.float32) / half)
    args = t[:, None].astype(jnp.float32) * freq[None, :]
    return jnp.concatenate([jnp.cos(args), jnp.sin(args)], axis=-1)


def _mish_ref(x):
    return x * jnp.tanh(jax.nn.softplus(x))


def _reference_forward(a_t, s, t, params):
    emb = timestep_embedding(t, EMB_DIM)
    x = jnp.concatenate([a_t, s, emb], axis=-1).astype(jnp.float32)
    w1, b1, w2, b2, w3, b3, w4, b4 = params
    h = _mish_ref(x @ w1 + b1)
    h = _mish_ref(h @ w2 + b2)
    h = _mish_ref(h @ w3 + b3)
    return h @ w4 + b4


def _reference_sample(s, a_init, noise_seq, sched, params):
    N = int(sched["beta"].shape[0])
    B = s.shape[0]
    a = a_init
    for g in range(N):
        i = N - g
        t = jnp.full((B,), i, dtype=jnp.int32)
        eps = _reference_forward(a, s, t, params)
        mean = (a - sched["beta"][i - 1] / jnp.sqrt(1.0 - sched["alpha_bar"][i - 1]) * eps) \
               / jnp.sqrt(sched["alpha"][i - 1])
        a = mean + (jnp.sqrt(sched["beta"][i - 1]) * noise_seq[g] if i > 1 else 0.0)
    return a


# ----------------------------------------------------------------------------- demo / checks
if __name__ == "__main__":
    B, STATE_DIM, ACTION_DIM, N_STEPS = 8, 16, 8, 30

    key = jax.random.PRNGKey(0)
    k_params, k_a, k_s, k_t, k_a0, k_noise = jax.random.split(key, 6)

    params = init_params(k_params, STATE_DIM, ACTION_DIM)
    prepared = prepare_params(params, STATE_DIM, ACTION_DIM)
    sched = make_schedule(N_STEPS)

    a_t = jax.random.normal(k_a, (B, ACTION_DIM), dtype=jnp.float32)
    s = jax.random.normal(k_s, (B, STATE_DIM), dtype=jnp.float32)
    t = jax.random.randint(k_t, (B,), 1, N_STEPS + 1)

    # --- single denoising-step forward (DiffusionPolicy.forward) ---
    eps_pred = jax.block_until_ready(
        diffusion_policy_forward(a_t, s, t, prepared["fwd"], a_dim=ACTION_DIM))
    eps_ref = _reference_forward(a_t, s, t, params)
    assert eps_pred.shape == (B, ACTION_DIM)
    err = float(jnp.max(jnp.abs(eps_pred - eps_ref)))
    scale = float(jnp.max(jnp.abs(eps_ref))) + 1.0
    assert err <= 5e-2 * scale, f"forward mismatch: err={err} scale={scale}"

    # --- fused 30-step reverse-diffusion sampler (DiffusionPolicy.sample) ---
    a_init = jax.random.normal(k_a0, (B, ACTION_DIM), dtype=jnp.float32)
    noise_seq = jax.random.normal(k_noise, (N_STEPS, B, ACTION_DIM), dtype=jnp.float32)
    a_smp = jax.block_until_ready(
        diffusion_policy_sample(s, a_init, noise_seq, sched, prepared["smp"],
                                a_dim=ACTION_DIM))
    a_ref = _reference_sample(s, a_init, noise_seq, sched, params)
    assert a_smp.shape == (B, ACTION_DIM)
    err = float(jnp.max(jnp.abs(a_smp - a_ref)))
    scale = float(jnp.max(jnp.abs(a_ref))) + 1.0
    assert err <= 5e-2 * scale, f"sample mismatch: err={err} scale={scale}"

    print("KERNEL_OK")
</pallas_src>

<mosaic_0001>
module attributes {stable_mosaic.version = 11 : i64} {
  func.func @eps_net_kernel(%arg0: memref<8x8xf32, #tpu.memory_space<vmem>>, %arg1: memref<8x16xf32, #tpu.memory_space<vmem>>, %arg2: memref<8x1xf32, #tpu.memory_space<vmem>>, %arg3: memref<8x256xbf16, #tpu.memory_space<vmem>>, %arg4: memref<16x256xbf16, #tpu.memory_space<vmem>>, %arg5: memref<64x256xbf16, #tpu.memory_space<vmem>>, %arg6: memref<64x256xbf16, #tpu.memory_space<vmem>>, %arg7: memref<1x256xf32, #tpu.memory_space<vmem>>, %arg8: memref<256x256xbf16, #tpu.memory_space<vmem>>, %arg9: memref<1x256xf32, #tpu.memory_space<vmem>>, %arg10: memref<256x256xbf16, #tpu.memory_space<vmem>>, %arg11: memref<1x256xf32, #tpu.memory_space<vmem>>, %arg12: memref<256x128xbf16, #tpu.memory_space<vmem>>, %arg13: memref<1x128xf32, #tpu.memory_space<vmem>>, %arg14: memref<8x128xf32, #tpu.memory_space<vmem>>) attributes {dimension_semantics = [], scalar_prefetch = 0 : i64, scratch_operands = 0 : i64, tpu.core_type = #tpu.core_type<tc>} {
    %c0 = arith.constant 0 : index
    %c0_0 = arith.constant 0 : index
    %0 = vector.load %arg2[%c0, %c0_0] : memref<8x1xf32, #tpu.memory_space<vmem>>, vector<8x1xf32>
    %1 = tpu.iota {dimensions = array<i32: 1>} : vector<1x64xi32>
    %2 = arith.sitofp %1 : vector<1x64xi32> to vector<1x64xf32>
    %cst = arith.constant -0.14391157 : f32
    %3 = vector.broadcast %cst : f32 to vector<1x64xf32>
    %4 = arith.mulf %3, %2 : vector<1x64xf32>
    %5 = math.exp %4 : vector<1x64xf32>
    %6 = vector.broadcast %0 : vector<8x1xf32> to vector<8x64xf32>
    %7 = vector.broadcast %5 : vector<1x64xf32> to vector<8x64xf32>
    %8 = arith.mulf %6, %7 : vector<8x64xf32>
    %9 = math.cos %8 : vector<8x64xf32>
    %10 = math.sin %8 : vector<8x64xf32>
    %c0_1 = arith.constant 0 : index
    %c0_2 = arith.constant 0 : index
    %11 = vector.load %arg0[%c0_1, %c0_2] : memref<8x8xf32, #tpu.memory_space<vmem>>, vector<8x8xf32>
    %c0_3 = arith.constant 0 : index
    %c0_4 = arith.constant 0 : index
    %12 = vector.load %arg1[%c0_3, %c0_4] : memref<8x16xf32, #tpu.memory_space<vmem>>, vector<8x16xf32>
    %13 = arith.truncf %11 : vector<8x8xf32> to vector<8x8xbf16>
    %c0_5 = arith.constant 0 : index
    %c0_6 = arith.constant 0 : index
    %14 = vector.load %arg3[%c0_5, %c0_6] : memref<8x256xbf16, #tpu.memory_space<vmem>>, vector<8x256xbf16>
    %cst_7 = arith.constant dense<0.000000e+00> : vector<8x256xf32>
    %15 = tpu.matmul %13, %14, %cst_7 {dimension_numbers = #tpu.dot_dimension_numbers<[1], [0], [0], [1], [0, 0, 1, 1], [], []>} : vector<8x8xbf16>, vector<8x256xbf16>, vector<8x256xf32> -> vector<8x256xf32>
    %16 = arith.truncf %12 : vector<8x16xf32> to vector<8x16xbf16>
    %c0_8 = arith.constant 0 : index
    %c0_9 = arith.constant 0 : index
    %17 = vector.load %arg4[%c0_8, %c0_9] : memref<16x256xbf16, #tpu.memory_space<vmem>>, vector<16x256xbf16>
    %cst_10 = arith.constant dense<0.000000e+00> : vector<8x256xf32>
    %18 = tpu.matmul %16, %17, %cst_10 {dimension_numbers = #tpu.dot_dimension_numbers<[1], [0], [0], [1], [0, 0, 1, 1], [], []>} : vector<8x16xbf16>, vector<16x256xbf16>, vector<8x256xf32> -> vector<8x256xf32>
    %19 = arith.addf %15, %18 : vector<8x256xf32>
    %20 = arith.truncf %9 : vector<8x64xf32> to vector<8x64xbf16>
    %c0_11 = arith.constant 0 : index
    %c0_12 = arith.constant 0 : index
    %21 = vector.load %arg5[%c0_11, %c0_12] : memref<64x256xbf16, #tpu.memory_space<vmem>>, vector<64x256xbf16>
    %cst_13 = arith.constant dense<0.000000e+00> : vector<8x256xf32>
    %22 = tpu.matmul %20, %21, %cst_13 {dimension_numbers = #tpu.dot_dimension_numbers<[1], [0], [0], [1], [0, 0, 1, 1], [], []>} : vector<8x64xbf16>, vector<64x256xbf16>, vector<8x256xf32> -> vector<8x256xf32>
    %23 = arith.addf %19, %22 : vector<8x256xf32>
    %24 = arith.truncf %10 : vector<8x64xf32> to vector<8x64xbf16>
    %c0_14 = arith.constant 0 : index
    %c0_15 = arith.constant 0 : index
    %25 = vector.load %arg6[%c0_14, %c0_15] : memref<64x256xbf16, #tpu.memory_space<vmem>>, vector<64x256xbf16>
    %cst_16 = arith.constant dense<0.000000e+00> : vector<8x256xf32>
    %26 = tpu.matmul %24, %25, %cst_16 {dimension_numbers = #tpu.dot_dimension_numbers<[1], [0], [0], [1], [0, 0, 1, 1], [], []>} : vector<8x64xbf16>, vector<64x256xbf16>, vector<8x256xf32> -> vector<8x256xf32>
    %27 = arith.addf %23, %26 : vector<8x256xf32>
    %c0_17 = arith.constant 0 : index
    %c0_18 = arith.constant 0 : index
    %28 = vector.load %arg7[%c0_17, %c0_18] : memref<1x256xf32, #tpu.memory_space<vmem>>, vector<1x256xf32>
    %29 = vector.broadcast %28 : vector<1x256xf32> to vector<8x256xf32>
    %30 = arith.addf %27, %29 : vector<8x256xf32>
    %cst_19 = arith.constant 3.000000e+01 : f32
    %31 = vector.broadcast %cst_19 : f32 to vector<8x256xf32>
    %32 = arith.minimumf %30, %31 : vector<8x256xf32>
    %33 = math.exp %32 : vector<8x256xf32>
    %cst_20 = arith.constant 2.000000e+00 : f32
    %34 = vector.broadcast %cst_20 : f32 to vector<8x256xf32>
    %35 = arith.addf %33, %34 : vector<8x256xf32>
    %36 = arith.mulf %33, %35 : vector<8x256xf32>
    %cst_21 = arith.constant 2.000000e+00 : f32
    %37 = vector.broadcast %cst_21 : f32 to vector<8x256xf32>
    %38 = arith.addf %36, %37 : vector<8x256xf32>
    %39 = tpu.reciprocal %38 {approx = true} : vector<8x256xf32> -> vector<8x256xf32>
    %40 = arith.mulf %36, %39 : vector<8x256xf32>
    %41 = arith.mulf %30, %40 : vector<8x256xf32>
    %42 = arith.truncf %41 : vector<8x256xf32> to vector<8x256xbf16>
    %c0_22 = arith.constant 0 : index
    %c0_23 = arith.constant 0 : index
    %43 = vector.load %arg8[%c0_22, %c0_23] : memref<256x256xbf16, #tpu.memory_space<vmem>>, vector<256x256xbf16>
    %cst_24 = arith.constant dense<0.000000e+00> : vector<8x256xf32>
    %44 = tpu.matmul %42, %43, %cst_24 {dimension_numbers = #tpu.dot_dimension_numbers<[1], [0], [0], [1], [0, 0, 1, 1], [], []>} : vector<8x256xbf16>, vector<256x256xbf16>, vector<8x256xf32> -> vector<8x256xf32>
    %c0_25 = arith.constant 0 : index
    %c0_26 = arith.constant 0 : index
    %45 = vector.load %arg9[%c0_25, %c0_26] : memref<1x256xf32, #tpu.memory_space<vmem>>, vector<1x256xf32>
    %46 = vector.broadcast %45 : vector<1x256xf32> to vector<8x256xf32>
    %47 = arith.addf %44, %46 : vector<8x256xf32>
    %cst_27 = arith.constant 3.000000e+01 : f32
    %48 = vector.broadcast %cst_27 : f32 to vector<8x256xf32>
    %49 = arith.minimumf %47, %48 : vector<8x256xf32>
    %50 = math.exp %49 : vector<8x256xf32>
    %cst_28 = arith.constant 2.000000e+00 : f32
    %51 = vector.broadcast %cst_28 : f32 to vector<8x256xf32>
    %52 = arith.addf %50, %51 : vector<8x256xf32>
    %53 = arith.mulf %50, %52 : vector<8x256xf32>
    %cst_29 = arith.constant 2.000000e+00 : f32
    %54 = vector.broadcast %cst_29 : f32 to vector<8x256xf32>
    %55 = arith.addf %53, %54 : vector<8x256xf32>
    %56 = tpu.reciprocal %55 {approx = true} : vector<8x256xf32> -> vector<8x256xf32>
    %57 = arith.mulf %53, %56 : vector<8x256xf32>
    %58 = arith.mulf %47, %57 : vector<8x256xf32>
    %59 = arith.truncf %58 : vector<8x256xf32> to vector<8x256xbf16>
    %c0_30 = arith.constant 0 : index
    %c0_31 = arith.constant 0 : index
    %60 = vector.load %arg10[%c0_30, %c0_31] : memref<256x256xbf16, #tpu.memory_space<vmem>>, vector<256x256xbf16>
    %cst_32 = arith.constant dense<0.000000e+00> : vector<8x256xf32>
    %61 = tpu.matmul %59, %60, %cst_32 {dimension_numbers = #tpu.dot_dimension_numbers<[1], [0], [0], [1], [0, 0, 1, 1], [], []>} : vector<8x256xbf16>, vector<256x256xbf16>, vector<8x256xf32> -> vector<8x256xf32>
    %c0_33 = arith.constant 0 : index
    %c0_34 = arith.constant 0 : index
    %62 = vector.load %arg11[%c0_33, %c0_34] : memref<1x256xf32, #tpu.memory_space<vmem>>, vector<1x256xf32>
    %63 = vector.broadcast %62 : vector<1x256xf32> to vector<8x256xf32>
    %64 = arith.addf %61, %63 : vector<8x256xf32>
    %cst_35 = arith.constant 3.000000e+01 : f32
    %65 = vector.broadcast %cst_35 : f32 to vector<8x256xf32>
    %66 = arith.minimumf %64, %65 : vector<8x256xf32>
    %67 = math.exp %66 : vector<8x256xf32>
    %cst_36 = arith.constant 2.000000e+00 : f32
    %68 = vector.broadcast %cst_36 : f32 to vector<8x256xf32>
    %69 = arith.addf %67, %68 : vector<8x256xf32>
    %70 = arith.mulf %67, %69 : vector<8x256xf32>
    %cst_37 = arith.constant 2.000000e+00 : f32
    %71 = vector.broadcast %cst_37 : f32 to vector<8x256xf32>
    %72 = arith.addf %70, %71 : vector<8x256xf32>
    %73 = tpu.reciprocal %72 {approx = true} : vector<8x256xf32> -> vector<8x256xf32>
    %74 = arith.mulf %70, %73 : vector<8x256xf32>
    %75 = arith.mulf %64, %74 : vector<8x256xf32>
    %76 = arith.truncf %75 : vector<8x256xf32> to vector<8x256xbf16>
    %c0_38 = arith.constant 0 : index
    %c0_39 = arith.constant 0 : index
    %77 = vector.load %arg12[%c0_38, %c0_39] : memref<256x128xbf16, #tpu.memory_space<vmem>>, vector<256x128xbf16>
    %cst_40 = arith.constant dense<0.000000e+00> : vector<8x128xf32>
    %78 = tpu.matmul %76, %77, %cst_40 {dimension_numbers = #tpu.dot_dimension_numbers<[1], [0], [0], [1], [0, 0, 1, 1], [], []>} : vector<8x256xbf16>, vector<256x128xbf16>, vector<8x128xf32> -> vector<8x128xf32>
    %c0_41 = arith.constant 0 : index
    %c0_42 = arith.constant 0 : index
    %79 = vector.load %arg13[%c0_41, %c0_42] : memref<1x128xf32, #tpu.memory_space<vmem>>, vector<1x128xf32>
    %80 = vector.broadcast %79 : vector<1x128xf32> to vector<8x128xf32>
    %81 = arith.addf %78, %80 : vector<8x128xf32>
    %c0_43 = arith.constant 0 : index
    %c0_44 = arith.constant 0 : index
    %82 = vector.load %arg14[%c0_43, %c0_44] : memref<8x128xf32, #tpu.memory_space<vmem>>, vector<8x128xf32>
    tpu.vector_store %arg14[%c0_43, %c0_44], %81 {strides = array<i32>} : memref<8x128xf32, #tpu.memory_space<vmem>>, vector<8x128xf32>,
    return
  }
}

</mosaic_0001>

<bundles_post_ra>
// kernel: diffusion_policy_forward.1
= control target key start
LH: loop header
LB: loop body
LE: loop exit
PB: predicated region body
PF: predicated region fallthrough
CT: control target
= control target key end

     0   :  { %19 = vsyncpa [#allocation3], 0  ;;  %s2535_s0 = inlined_call_operand.vmem [shape: f32[8,8], index: 0, kind: input, shape index: {}]   ;;  %s2536_s1 = inlined_call_operand.hbm [shape: f32[8,16], index: 1, kind: input, shape index: {}]   ;;  %s2537_s2 = inlined_call_operand.vmem [shape: f32[8,1], index: 2, kind: input, shape index: {}]   ;;  %s2538_s3 = inlined_call_operand.hbm [shape: bf16[8,256], index: 3, kind: input, shape index: {}]   ;;  %s2539_s4 = inlined_call_operand.hbm [shape: bf16[16,256], index: 4, kind: input, shape index: {}]   ;;  %s2540_s5 = inlined_call_operand.hbm [shape: bf16[64,256], index: 5, kind: input, shape index: {}]   ;;  %s2541_s6 = inlined_call_operand.hbm [shape: bf16[64,256], index: 6, kind: input, shape index: {}]   ;;  %s2542_s7 = inlined_call_operand.vmem [shape: f32[1,256], index: 7, kind: input, shape index: {}]   ;;  %s2543_s8 = inlined_call_operand.hbm [shape: bf16[256,256], index: 8, kind: input, shape index: {}]   ;;  %s2544_s9 = inlined_call_operand.vmem [shape: f32[1,256], index: 9, kind: input, shape index: {}]   ;;  %s2545_s10 = inlined_call_operand.hbm [shape: bf16[256,256], index: 10, kind: input, shape index: {}]   ;;  %s2546_s11 = inlined_call_operand.vmem [shape: f32[1,256], index: 11, kind: input, shape index: {}]   ;;  %s2547_s12 = inlined_call_operand.hbm [shape: bf16[256,128], index: 12, kind: input, shape index: {}]   ;;  %s2548_s13 = inlined_call_operand.vmem [shape: f32[1,128], index: 13, kind: input, shape index: {}]   ;;  %s2549_s14 = inlined_call_operand.hbm [shape: f32[8,128], index: 14, kind: output, shape index: {}]  }
   0x1   :  { %20 = vsyncpa [#allocation6], 0 }
   0x2   :  { %21 = vsyncpa [#allocation9], 0 }
   0x3   :  { %22 = vsyncpa [#allocation12], 0 }
   0x4   :  { %23 = vsyncpa [#allocation15], 0  ;;  %s45_s15 = sshll.u32 %s2538_s3, 4  ;;  %s46_s15 = int_to_ptr.hbm [resolvable:$true] %s45_s15 }
   0x5   :  { %24 = vsyncpa [#allocation4], 0  ;;  %s2270_s16 = smov [#allocation5]   ;;  %s68_s20 = sshll.u32 %s2540_s5, 4  ;;  %s69_s20 = int_to_ptr.hbm [resolvable:$true] %s68_s20 }
   0x6   :  { %s47_s17 = sshll.u32 %s2270_s16, 4  ;;  %s2271_s21 = smov [#allocation8]   ;;  %s48_s17 = int_to_ptr.vmem [resolvable:$true] %s47_s17 }
   0x7   :  { %50 = dma.hbm_to_vmem [thread:$0]  %s46_s15, 128, %s48_s17, [#allocation6]  }
   0x8   :  { %s70_s22 = sshll.u32 %s2271_s21, 4  ;;  %s96_s25 = sshll.u32 %s2543_s8, 4  ;;  %s71_s22 = int_to_ptr.vmem [resolvable:$true] %s70_s22  ;;  %s97_s25 = int_to_ptr.hbm [resolvable:$true] %s96_s25 }
   0x9   :  { %s2272_s3 = smov 128   ;;  %s2273_s26 = smov 8  }
   0xa   :  { %76 = dma.hbm_to_vmem [thread:$0]  %s69_s20, 1024, %s71_s22, [#allocation9], %s2272_s3, %s2272_s3, %s2273_s26  }
   0xb   :  { %s32_s29 = sshll.u32 %s2536_s1, 4  ;;  %s2274_s5 = smov [#allocation11]   ;;  %s33_s29 = int_to_ptr.hbm [resolvable:$true] %s32_s29 }
   0xc   :  { %s98_s30 = sshll.u32 %s2274_s5, 4  ;;  %s2275_s8 = smov [#allocation2]   ;;  %s99_s30 = int_to_ptr.vmem [resolvable:$true] %s98_s30 }
   0xd   :  { %104 = dma.hbm_to_vmem [thread:$0]  %s97_s25, 4096, %s99_s30, [#allocation12], %s2272_s3, %s2272_s3, %s2273_s26  }
   0xe   :  { %s34_s15 = sshll.u32 %s2275_s8, 4  ;;  %s55_s18 = sshll.u32 %s2539_s4, 4  ;;  %s35_s15 = int_to_ptr.vmem [resolvable:$true] %s34_s15  ;;  %s56_s18 = int_to_ptr.hbm [resolvable:$true] %s55_s18 }
   0xf   :  { %37 = dma.hbm_to_vmem [thread:$0]  %s33_s29, 128, %s35_s15, [#allocation3]  }
  0x10   :  { %s81_s1 = sshll.u32 %s2541_s6, 4  ;;  %s2276_s21 = smov [#allocation7]   ;;  %s82_s1 = int_to_ptr.hbm [resolvable:$true] %s81_s1 }
  0x11   :  { %s57_s22 = sshll.u32 %s2276_s21, 4  ;;  %s2277_s23 = smov [#allocation10]   ;;  %s58_s22 = int_to_ptr.vmem [resolvable:$true] %s57_s22 }
  0x12   :  { %63 = dma.hbm_to_vmem [thread:$0]  %s56_s18, 256, %s58_s22, [#allocation6], %s2272_s3, %s2272_s3, %s2273_s26  }
  0x13   :  { %s83_s24 = sshll.u32 %s2277_s23, 4  ;;  %s111_s4 = sshll.u32 %s2545_s10, 4  ;;  %s84_s24 = int_to_ptr.vmem [resolvable:$true] %s83_s24  ;;  %s112_s4 = int_to_ptr.hbm [resolvable:$true] %s111_s4 }
  0x14   :  { %89 = dma.hbm_to_vmem [thread:$0]  %s82_s1, 1024, %s84_s24, [#allocation9], %s2272_s3, %s2272_s3, %s2273_s26  }
  0x15   :  { %s126_s29 = sshll.u32 %s2547_s12, 4  ;;  %s2278_s5 = smov [#allocation13]   ;;  %s127_s29 = int_to_ptr.hbm [resolvable:$true] %s126_s29 }
  0x16   :  { %s113_s30 = sshll.u32 %s2278_s5, 4  ;;  %s2279_s8 = smov [#allocation14]   ;;  %s114_s30 = int_to_ptr.vmem [resolvable:$true] %s113_s30 }
  0x17   :  { %119 = dma.hbm_to_vmem [thread:$0]  %s112_s4, 4096, %s114_s30, [#allocation12], %s2272_s3, %s2272_s3, %s2273_s26  }
  0x18   :  { %s128_s10 = sshll.u32 %s2279_s8, 4  ;;  %s2280_s15 = smov 64   ;;  %s129_s10 = int_to_ptr.vmem [resolvable:$true] %s128_s10 }
  0x19   :  { %s2281_s16 = smov 4  }
  0x1a   :  { %134 = dma.hbm_to_vmem [thread:$0]  %s127_s29, 2048, %s129_s10, [#allocation15], %s2280_s15, %s2280_s15, %s2281_s16  }
  0x1b   :  { %2258 = dma.done.wait [#allocation3], 128  }
  0x1c   :  { %2259 = vsyncadd [#allocation3], 4294967168 }
  0x1d   :  { %2260 = dma.done.wait [#allocation6], 384  }
  0x1e   :  { %2261 = vsyncadd [#allocation6], 4294966912 }
  0x1f   :  { %2262 = dma.done.wait [#allocation9], 2048  }
  0x20   :  { %2263 = vsyncadd [#allocation9], 4294965248 }
  0x21   :  { %2264 = dma.done.wait [#allocation12], 8192  }
  0x22   :  { %2265 = vsyncadd [#allocation12], 4294959104 }
  0x23   :  { %2266 = dma.done.wait [#allocation15], 2048  }
  0x24   :  { %2267 = vsyncadd [#allocation15], 4294965248  ;;  %v2282_v0 = vmov 0   ;;  %v170_v1 = vld [vmem:[%s2537_s2] sm:$0xff]  ;;  %v171_v2 = vlaneseq  ;;  %v2283_v21 = vmov 683565275  }
  0x25   :  { %2014 = vset.pattern.permute.xlu0 %v2282_v0  ;;  %v2284_v23 = vmov 2475754826   ;;  %v2285_v26 = vmov 2131351028   ;;  %v2286_v29 = vmov 2102212464  }
  0x26   :  { %179 = vperm.xlu0 %2014, %v170_v1   ;;  %v172_v3 = vand.u32 127, %v171_v2  ;;  %v2287_v32 = vmov 920167782   ;;  %v2288_v35 = vmov 1326507024   ;;  %vm548_vm10 = vcmask 1043456  }
  0x27   :  { %vm544_vm11 = vcmask 64512   ;;  %vm509_vm13 = vcmask 130048   ;;  %s2289_s1 = smov [#allocation16]   ;;  %s1476_s24 = sshll.u32 %s2549_s14, 4  ;;  %s1477_s24 = int_to_ptr.hbm [resolvable:$true] %s1476_s24 }
  0x28   :  { %v173_v4 = vcvt.s32.f32 %v172_v3  ;;  %s1474_s21 = sshll.u32 %s2289_s1, 4  ;;  %s1475_s21 = int_to_ptr.vmem [resolvable:$true] %s1474_s21 }
  0x2a   :  { %v174_v5 = vmul.f32 -0.14391157, %v173_v4 }
  0x2c   :  { %v175_v6 = vmul.f32 1.442695, %v174_v5 }
  0x2e   :  { %2016 = vpow2.f32 %v175_v6 }
  0x34   :  { %v2017_v7 = vpop.eup %2016 }
  0x98   :  { %v180_v8 = vpop.permute.xlu0 %179 }
  0x99   :  { %v2408_v9 = vmul.f32 %v2017_v7, %v180_v8 }
  0x9b   :  { %v186_v10 = vand.u32 2139095040, %v2408_v9  ;;  %v183_v13 = vand.u32 2147483647, %v2408_v9  ;;  %vm185_vm15 = vcmp.lt.s32.totalorder %v2408_v9, 0 }
  0x9d   :  { %v187_v11 = vshrl.u32 %v186_v10, 23  ;;  %v190_v15 = vand.u32 8388607, %v183_v13 }
  0x9f   :  { %v1490_v12 = vadd.s32 4294967169, %v187_v11  ;;  %v191_v19 = vor.u32 8388608, %v190_v15 }
  0xa1   :  { %v193_v14 = vadd.s32 1, %v1490_v12  ;;  %v2425_v42 = vshll.u32 %v191_v19, 8 }
  0xa3   :  { %vm194_vm0 = vcmp.gt.s32.totalorder %v193_v14, 0  ;;  %v232_v51 = vand.u32 65535, %v2425_v42  ;;  %v233_v52 = vshrl.u32 %v2425_v42, 16 }
  0xa4   :  { %v195_v16 = vsel %vm194_vm0, %v193_v14, 0  ;;  %vm2482_vm0 = vcmp.le.f32.partialorder %v183_v13, 0.7853982 }
  0xa5   :  { %v197_v17 = vand.u32 31, %v195_v16  ;;  %v2416_v20 = vshrl.u32 %v195_v16, 5 }
  0xa7   :  { %v2414_v18 = vsub.s32 32, %v197_v17  ;;  %v200_v22 = vshll.u32 %v2283_v21, %v197_v17  ;;  %v203_v24 = vshll.u32 %v2284_v23, %v197_v17  ;;  %v206_v28 = vshll.u32 %v2285_v26, %v197_v17 }
  0xa8   :  { %v209_v31 = vshll.u32 %v2286_v29, %v197_v17  ;;  %v212_v34 = vshll.u32 %v2287_v32, %v197_v17  ;;  %vm215_vm1 = vcmp.lt.s32.totalorder %v2416_v20, 1  ;;  %vm218_vm2 = vcmp.lt.s32.totalorder %v2416_v20, 4 }
  0xa9   :  { %v201_v25 = vshrl.u32 %v2284_v23, %v2414_v18  ;;  %v204_v27 = vshrl.u32 %v2285_v26, %v2414_v18  ;;  %v207_v30 = vshrl.u32 %v2286_v29, %v2414_v18  ;;  %v210_v33 = vshrl.u32 %v2287_v32, %v2414_v18 }
  0xaa   :  { %v213_v36 = vshrl.u32 %v2288_v35, %v2414_v18  ;;  %vm217_vm3 = vcmp.lt.s32.totalorder %v2416_v20, 3  ;;  %vm216_vm4 = vcmp.lt.s32.totalorder %v2416_v20, 2  ;;  %v199_v16 = vshrl.u32 %v2283_v21, %v2414_v18  ;;  %v495_v18 = vld [vmem:[#allocation5] sm:$0xff]  ;;  %v492_v20 = vld [vmem:[%s2535_s0] sm:$0xff] }
  0xab   :  { %v202_v37 = vor.u32 %v201_v25, %v200_v22  ;;  %v205_v38 = vor.u32 %v204_v27, %v203_v24  ;;  %v208_v39 = vor.u32 %v207_v30, %v206_v28  ;;  %v211_v40 = vor.u32 %v210_v33, %v209_v31 }
  0xac   :  { %v214_v41 = vor.u32 %v213_v36, %v212_v34  ;;  %v540_v33 = vunpack.c.l.b16 %v495_v18  ;;  %v541_v36 = vunpack.c.h.b16 %v495_v18 }
  0xad   :  { %v223_v43 = vsel %vm215_vm1, %v202_v37, %v205_v38  ;;  %v227_v44 = vsel %vm215_vm1, %v205_v38, %v208_v39  ;;  %v224_v45 = vsel %vm218_vm2, %v211_v40, 920167782  ;;  %v220_v12 = vsel %vm218_vm2, %v208_v39, 2102212464 }
  0xae   :  { %v228_v46 = vsel %vm218_vm2, %v214_v41, 1326507024  ;;  %v225_v47 = vsel %vm217_vm3, %v208_v39, %v224_v45  ;;  %v219_v25 = vsel %vm215_vm1, %v199_v16, %v202_v37  ;;  %v221_v26 = vsel %vm217_vm3, %v205_v38, %v220_v12  ;;  %v1520_v16 = vld [vmem:[#allocation8 + $0x18] sm:$0xf0] }
  0xaf   :  { %v229_v48 = vsel %vm217_vm3, %v211_v40, %v228_v46  ;;  %v226_v49 = vsel %vm216_vm4, %v223_v43, %v225_v47  ;;  %v542_v35 = vpack.c.b16 %v540_v33, %v540_v33  ;;  %v543_v40 = vpack.c.b16 %v541_v36, %v541_v36 }
  0xb0   :  { %v230_v50 = vsel %vm216_vm4, %v227_v44, %v229_v48  ;;  %v256_v55 = vand.u32 65535, %v226_v49  ;;  %v257_v56 = vshrl.u32 %v226_v49, 16  ;;  %v494_v44 = vpack.c.bf16 %v492_v20, %v492_v20  ;;  %v1534_v48 = vld [vmem:[#allocation8 + $0x30] sm:$0xf]  ;;  %v1905_v49 = vld [vmem:[#allocation8 + $0x34] sm:$0xf0] }
  0xb1   :  { %v234_v53 = vand.u32 65535, %v230_v50  ;;  %v235_v54 = vshrl.u32 %v230_v50, 16  ;;  %v550_v39 = vsel %vm548_vm10, %v542_v35, 0  ;;  %v553_v43 = vsel %vm548_vm10, %v543_v40, 0  ;;  %v1912_v35 = vld [vmem:[#allocation10 + $0x34] sm:$0xf] }
  0xb2   :  { %v259_v59 = vmul.u32 %v257_v56, %v232_v51  ;;  %v260_v60 = vmul.u32 %v256_v55, %v233_v52  ;;  %v258_v1 = vmul.u32 %v256_v55, %v232_v51  ;;  %v261_v5 = vmul.u32 %v257_v56, %v233_v52  ;;  %562 = vmatpush.bf16.msra.mxu2 %v550_v39  ;;  %v1897_v55 = vld [vmem:[#allocation7 + $0x4] sm:$0xf0]  ;;  %v1570_v39 = vld [vmem:[#allocation10 + $0x38] sm:$0xf0]  ;;  %v1560_v40 = vld [vmem:[#allocation10 + $0x20] sm:$0xf] }
  0xb3   :  { %v237_v57 = vmul.u32 %v235_v54, %v232_v51  ;;  %v238_v58 = vmul.u32 %v234_v53, %v233_v52  ;;  %v236_v61 = vmul.u32 %v234_v53, %v232_v51  ;;  %v239_v63 = vmul.u32 %v235_v54, %v233_v52  ;;  %575 = vmatpush.bf16.msra.mxu3 %v553_v43  ;;  %v1904_v52 = vld [vmem:[#allocation8 + $0x34] sm:$0xf]  ;;  %v1536_v53 = vld [vmem:[#allocation8 + $0x38] sm:$0xf0]  ;;  %v1498_v54 = vld [vmem:[#allocation7] sm:$0xf] }
  0xb4   :  { %v262_v2 = vshll.u32 %v259_v59, 16  ;;  %v264_v7 = vshll.u32 %v260_v60, 16  ;;  %v263_v23 = vshrl.u32 %v259_v59, 16  ;;  %v265_v29 = vshrl.u32 %v260_v60, 16  ;;  %v1526_v60 = vld [vmem:[#allocation8 + $0x20] sm:$0xf] }
  0xb5   :  { %v240_v62 = vshll.u32 %v237_v57, 16  ;;  %v242_v3 = vshll.u32 %v238_v58, 16  ;;  %v241_v17 = vshrl.u32 %v237_v57, 16  ;;  %v243_v27 = vshrl.u32 %v238_v58, 16  ;;  %1506 = vmatmul.msk.bf16.vlgmr.msra.gmra.mxu2 %vm544_vm11, %v494_v44  ;;  %v1911_v20 = vld [vmem:[#allocation10 + $0x24] sm:$0xf0] }
  0xb6   :  { %vm266_vm6 = vc.u32 %v258_v1, %v262_v2  ;;  %v268_v8 = vadd.s32 %v262_v2, %v258_v1  ;;  %1507 = vmatmul.msk.bf16.vlgmr.msra.gmra.mxu3 %vm544_vm11, %v494_v44  ;;  %v1535_v51 = vor.u32 %v1905_v49, %v1534_v48  ;;  %v1539_v57 = vor.u32 %v1904_v52, %v1536_v53  ;;  %v1500_v1 = vld [vmem:[#allocation7 + $0x8] sm:$0xf0]  ;;  %v1902_v2 = vld [vmem:[#allocation8 + $0x24] sm:$0xf]  ;;  %v1562_v44 = vld [vmem:[#allocation10 + $0x28] sm:$0xf0] }
  0xb7   :  { %vm244_vm5 = vc.u32 %v236_v61, %v240_v62  ;;  %v246_v4 = vadd.s32 %v240_v62, %v236_v61  ;;  %v267_v11 = vsel %vm266_vm6, 1, %v2282_v0  ;;  %v1499_v58 = vor.u32 %v1897_v55, %v1498_v54  ;;  %v1903_v61 = vld [vmem:[#allocation8 + $0x24] sm:$0xf0]  ;;  %v1896_v62 = vld [vmem:[#allocation7 + $0x4] sm:$0xf] }
  0xb8   :  { %v245_v6 = vsel %vm244_vm5, 1, %v2282_v0  ;;  %v269_v15 = vadd.s32 %v267_v11, %v261_v5  ;;  %vm270_vm8 = vc.u32 %v268_v8, %v264_v7  ;;  %v2462_v32 = vadd.s32 %v268_v8, %v264_v7  ;;  %638 = vmatpush.bf16.msrb.mxu2 %v1535_v51  ;;  %651 = vmatpush.bf16.msrb.mxu3 %v1539_v57  ;;  %v493_v7 = vld [vmem:[#allocation2] sm:$0xff]  ;;  %v1901_v11 = vld [vmem:[#allocation8 + $0x14] sm:$0xf0]  ;;  %v1552_v48 = vld [vmem:[#allocation10 + $0x10] sm:$0xf] }
  0xb9   :  { %v247_v10 = vadd.s32 %v245_v6, %v239_v63  ;;  %vm248_vm7 = vc.u32 %v246_v4, %v242_v3  ;;  %v271_v22 = vsel %vm270_vm8, 1, %v2282_v0  ;;  %520 = vmatpush.bf16.msra.mxu0 %v1499_v58  ;;  %v1527_v63 = vor.u32 %v1903_v61, %v1526_v60  ;;  %v1528_v3 = vld [vmem:[#allocation8 + $0x28] sm:$0xf0]  ;;  %v1910_v43 = vld [vmem:[#allocation10 + $0x24] sm:$0xf] }
  0xba   :  { %v249_v14 = vsel %vm248_vm7, 1, %v2282_v0  ;;  %v273_v24 = vadd.s32 %v271_v22, %v269_v15  ;;  %v222_v0 = vsel %vm216_vm4, %v219_v25, %v221_v26  ;;  %v1503_v5 = vor.u32 %v1896_v62, %v1500_v1  ;;  %v1900_v15 = vld [vmem:[#allocation8 + $0x14] sm:$0xf]  ;;  %v1899_v25 = vld [vmem:[#allocation8 + $0x4] sm:$0xf0] }
  0xbb   :  { %v251_v19 = vadd.s32 %v249_v14, %v247_v10  ;;  %v276_v37 = vmul.u32 %v2425_v42, %v222_v0  ;;  %v1531_v6 = vor.u32 %v1902_v2, %v1528_v3  ;;  %v496_v8 = vpack.c.bf16 %v493_v7, %v493_v7  ;;  %v1518_v10 = vld [vmem:[#allocation8 + $0x10] sm:$0xf]  ;;  %v1909_v49 = vld [vmem:[#allocation10 + $0x14] sm:$0xf0]  ;;  %v1908_v51 = vld [vmem:[#allocation10 + $0x14] sm:$0xf] }
  0xbc   :  { %v274_v30 = vadd.s32 %v273_v24, %v263_v23  ;;  %639 = vmatpush.bf16.msrb.mxu2 %v1527_v63  ;;  %533 = vmatpush.bf16.msra.mxu1 %v1503_v5  ;;  %v1519_v14 = vor.u32 %v1901_v11, %v1518_v10  ;;  %v1523_v23 = vor.u32 %v1900_v15, %v1520_v16  ;;  %v1510_v24 = vld [vmem:[#allocation8] sm:$0xf]  ;;  %v1554_v52 = vld [vmem:[#allocation10 + $0x18] sm:$0xf0]  ;;  %v1906_v61 = vld [vmem:[#allocation10 + $0x4] sm:$0xf]  ;;  %vm326_vm4 = vweird.f32 %v2408_v9 }
  0xbd   :  { %v252_v28 = vadd.s32 %v251_v19, %v241_v17  ;;  %652 = vmatpush.bf16.msrb.mxu3 %v1531_v6  ;;  %1504 = vmatmul.msk.bf16.vlgmr.msra.gmra.mxu0 %vm509_vm13, %v496_v8  ;;  %v1511_v26 = vor.u32 %v1899_v25, %v1510_v24  ;;  %v1553_v55 = vor.u32 %v1909_v49, %v1552_v48  ;;  %v1544_v58 = vld [vmem:[#allocation10] sm:$0xf]  ;;  %v1546_v62 = vld [vmem:[#allocation10 + $0x8] sm:$0xf0]  ;;  %vm630_vm5 = vcmask 523264  }
  0xbe   :  { %v275_v21 = vadd.s32 %v274_v30, %v265_v29  ;;  %v1557_v57 = vor.u32 %v1908_v51, %v1554_v52  ;;  %v1549_v3 = vor.u32 %v1906_v61, %v1546_v62  ;;  %v1944_v48 = vld [vmem:[#allocation11 + $0xf4] sm:$0xf]  ;;  %v1700_v49 = vld [vmem:[#allocation11 + $0xf8] sm:$0xf0]  ;;  %v1626_v52 = vld [vmem:[#allocation11 + $0x60] sm:$0xf] }
  0xbf   :  { %v2460_v31 = vadd.s32 %v252_v28, %v243_v27  ;;  %1505 = vmatmul.msk.bf16.vlgmr.msra.gmra.mxu1 %vm509_vm13, %v496_v8  ;;  %v1898_v27 = vld [vmem:[#allocation8 + $0x4] sm:$0xf]  ;;  %v1512_v28 = vld [vmem:[#allocation8 + $0x8] sm:$0xf0]  ;;  %v1703_v51 = vor.u32 %v1944_v48, %v1700_v49  ;;  %v1927_v53 = vld [vmem:[#allocation11 + $0x64] sm:$0xf0] }
  0xc0   :  { %v279_v34 = vadd.s32 1, %v275_v21  ;;  %640 = vmatpush.bf16.msrb.mxu2 %v1519_v14  ;;  %v1515_v0 = vor.u32 %v1898_v27, %v1512_v28  ;;  %v1942_v61 = vld [vmem:[#allocation11 + $0xe4] sm:$0xf]  ;;  %v1692_v62 = vld [vmem:[#allocation11 + $0xe8] sm:$0xf0] }
  0xc1   :  { %vm278_vm9 = vc.u32 %v2460_v31, %v2462_v32  ;;  %v277_v17 = vadd.s32 %v2462_v32, %v2460_v31  ;;  %653 = vmatpush.bf16.msrb.mxu3 %v1523_v23  ;;  %v1568_v32 = vld [vmem:[#allocation10 + $0x30] sm:$0xf]  ;;  %v1918_v48 = vld [vmem:[#allocation11 + $0x24] sm:$0xf]  ;;  %v1596_v49 = vld [vmem:[#allocation11 + $0x28] sm:$0xf0] }
  0xc2   :  { %v280_v38 = vsel %vm278_vm9, %v279_v34, %v275_v21  ;;  %v1913_v34 = vld [vmem:[#allocation10 + $0x34] sm:$0xf0] }
  0xc3   :  { %v281_v41 = vadd.s32 %v280_v38, %v276_v37  ;;  %v1569_v38 = vor.u32 %v1913_v34, %v1568_v32 }
  0xc4   :  { %641 = vmatpush.bf16.msrb.mxu2 %v1511_v26 }
  0xc5   :  { %v282_v45 = vadd.s32 536870912, %v281_v41  ;;  %654 = vmatpush.bf16.msrb.mxu3 %v1515_v0 }
  0xc7   :  { %v2472_v46 = vshrl.u32 %v282_v45, 30 }
  0xc8   :  { %718 = vmatpush.bf16.msra.mxu2 %v1569_v38 }
  0xc9   :  { %v284_v42 = vshll.u32 %v2472_v46, 30  ;;  %v307_v2 = vsub.s32 4, %v2472_v46 }
  0xcb   :  { %v285_v47 = vsub.s32 %v281_v41, %v284_v42  ;;  %v1573_v41 = vor.u32 %v1912_v35, %v1570_v39  ;;  %v1561_v42 = vor.u32 %v1911_v20, %v1560_v40  ;;  %v308_v8 = vsel %vm185_vm15, %v307_v2, %v2472_v46  ;;  %v1634_v40 = vld [vmem:[#allocation11 + $0x70] sm:$0xf] }
  0xcc   :  { %v1682_v2 = vld [vmem:[#allocation11 + $0xd0] sm:$0xf] }
  0xcd   :  { %vm286_vm12 = vcmp.lt.s32.totalorder %v285_v47, 0  ;;  %v287_v50 = vsub.s32 0, %v285_v47  ;;  %731 = vmatpush.bf16.msra.mxu3 %v1573_v41  ;;  %719 = vmatpush.bf16.msra.mxu2 %v1561_v42  ;;  %v1929_v41 = vld [vmem:[#allocation11 + $0x74] sm:$0xf0] }
  0xce   :  { %v1635_v20 = vor.u32 %v1929_v41, %v1634_v40 }
  0xcf   :  { %v288_v56 = vsel %vm286_vm12, %v287_v50, %v285_v47 }
  0xd0   :  { %v289_v59 = vclz %v288_v56  ;;  %968 = vmatpush.bf16.msrb.mxu0 %v1635_v20  ;;  %v1594_v20 = vld [vmem:[#allocation11 + $0x20] sm:$0xf] }
  0xd1   :  { %720 = vmatpush.bf16.msra.mxu2 %v1553_v55  ;;  %v1627_v55 = vor.u32 %v1927_v53, %v1626_v52  ;;  %v742_v52 = vld [vmem:[%s2542_s7] sm:$0x3] }
  0xd2   :  { %v1491_v4 = vadd.s32 4294967294, %v289_v59  ;;  %v1907_v59 = vld [vmem:[#allocation10 + $0x4] sm:$0xf0] }
  0xd3   :  { %v1545_v1 = vor.u32 %v1907_v59, %v1544_v58  ;;  %v1628_v58 = vld [vmem:[#allocation11 + $0x68] sm:$0xf0] }
  0xd4   :  { %vm1492_vm14 = vcmp.lt.s32.totalorder %v1491_v4, 0  ;;  %969 = vmatpush.bf16.msrb.mxu0 %v1627_v55 }
  0xd5   :  { %v292_v12 = vsel %vm1492_vm14, 0, %v1491_v4  ;;  %721 = vmatpush.bf16.msra.mxu2 %v1545_v1  ;;  %v1925_v1 = vld [vmem:[#allocation11 + $0x54] sm:$0xf0] }
  0xd6   :  { %v293_v19 = vsub.s32 32, %v292_v12  ;;  %v297_v22 = vsub.s32 4294967266, %v292_v12  ;;  %v294_v29 = vshll.u32 %v285_v47, %v292_v12  ;;  %v1565_v47 = vor.u32 %v1910_v43, %v1562_v44  ;;  %v1698_v43 = vld [vmem:[#allocation11 + $0xf0] sm:$0xf]  ;;  %v1945_v44 = vld [vmem:[#allocation11 + $0xf4] sm:$0xf0] }
  0xd7   :  { %v310_v12 = vsel %vm2482_vm0, 0, %v308_v8  ;;  %v1699_v42 = vor.u32 %v1945_v44, %v1698_v43  ;;  %v1919_v43 = vld [vmem:[#allocation11 + $0x24] sm:$0xf0] }
  0xd8   :  { %v295_v30 = vshrl.u32 %v277_v17, %v293_v19  ;;  %v298_v18 = vadd.s32 127, %v297_v22  ;;  %732 = vmatpush.bf16.msra.mxu3 %v1565_v47  ;;  %v327_v19 = vand.u32 3, %v310_v12  ;;  %v481_v46 = vadd.s32 3, %v310_v12  ;;  %v1636_v47 = vld [vmem:[#allocation11 + $0x78] sm:$0xf0] }
  0xd9   :  { %981 = vmatpush.bf16.msrb.mxu1 %v1699_v42  ;;  %v1684_v12 = vld [vmem:[#allocation11 + $0xd8] sm:$0xf0]  ;;  %v1658_v42 = vld [vmem:[#allocation11 + $0xa0] sm:$0xf]  ;;  %v1595_v53 = vor.u32 %v1919_v43, %v1594_v20 }
  0xda   :  { %v296_v21 = vor.u32 %v295_v30, %v294_v29  ;;  %v299_v33 = vshll.u32 %v298_v18, 23  ;;  %vm329_vm1 = vcmp.eq.s32.totalorder %v327_v19, 0  ;;  %vm332_vm2 = vcmp.eq.s32.totalorder %v327_v19, 2 }
  0xdb   :  { %vm328_vm3 = vcmp.lt.s32.totalorder %v327_v19, 2  ;;  %v482_v30 = vand.u32 3, %v481_v46  ;;  %v1674_v19 = vld [vmem:[#allocation11 + $0xc0] sm:$0xf] }
  0xdc   :  { %v300_v31 = vor.u32 4788187, %v299_v33  ;;  %v303_v37 = vcvt.s32.f32 %v296_v21  ;;  %733 = vmatpush.bf16.msra.mxu3 %v1557_v57  ;;  %v1926_v57 = vld [vmem:[#allocation11 + $0x64] sm:$0xf] }
  0xdd   :  { %vm484_vm6 = vcmp.eq.s32.totalorder %v482_v30, 0  ;;  %vm487_vm7 = vcmp.eq.s32.totalorder %v482_v30, 2  ;;  %vm483_vm8 = vcmp.lt.s32.totalorder %v482_v30, 2 }
  0xde   :  { %v301_v36 = vand.u32 2147483647, %v300_v31 }
  0xe0   :  { %v304_v45 = vmul.f32 %v303_v37, %v301_v36  ;;  %734 = vmatpush.bf16.msra.mxu3 %v1549_v3  ;;  %v1941_v3 = vld [vmem:[#allocation11 + $0xd4] sm:$0xf0] }
  0xe2   :  { %v305_v50 = vxor.u32 2147483648, %v304_v45 }
  0xe4   :  { %v306_v54 = vsel %vm185_vm15, %v305_v50, %v304_v45  ;;  %v1928_v45 = vld [vmem:[#allocation11 + $0x74] sm:$0xf] }
  0xe5   :  { %v309_v56 = vsel %vm2482_vm0, %v2408_v9, %v306_v54  ;;  %v1639_v50 = vor.u32 %v1928_v45, %v1636_v47  ;;  %v1690_v54 = vld [vmem:[#allocation11 + $0xe0] sm:$0xf]  ;;  %v1935_v47 = vld [vmem:[#allocation11 + $0xa4] sm:$0xf0] }
  0xe6   :  { %v311_v60 = vmul.f32 %v309_v56, %v309_v56  ;;  %v1659_v55 = vor.u32 %v1935_v47, %v1658_v42 }
  0xe8   :  { %v319_v13 = vmul.f32 -0.00019511016, %v311_v60  ;;  %v312_v63 = vmul.f32 -0.001358992, %v311_v60 }
  0xea   :  { %v320_v4 = vadd.f32 0.008332121, %v319_v13  ;;  %v313_v5 = vadd.f32 0.041655596, %v312_v63  ;;  %v1618_v13 = vld [vmem:[#allocation11 + $0x50] sm:$0xf]  ;;  %v1695_v63 = vor.u32 %v1942_v61, %v1692_v62 }
  0xeb   :  { %v1933_v62 = vld [vmem:[#allocation11 + $0x94] sm:$0xf0] }
  0xec   :  { %v321_v6 = vmul.f32 %v320_v4, %v311_v60  ;;  %v314_v7 = vmul.f32 %v313_v5, %v311_v60  ;;  %v1619_v4 = vor.u32 %v1925_v1, %v1618_v13  ;;  %v1924_v5 = vld [vmem:[#allocation11 + $0x54] sm:$0xf]  ;;  %v744_v1 = vperm.slane %v742_v52, 0 }
  0xed   :  { %v1916_v13 = vld [vmem:[#allocation11 + $0x14] sm:$0xf] }
  0xee   :  { %v322_v10 = vadd.f32 -0.16666654, %v321_v6  ;;  %v315_v11 = vadd.f32 -0.4999988, %v314_v7  ;;  %v1620_v6 = vld [vmem:[#allocation11 + $0x58] sm:$0xf0]  ;;  %970 = vmatpush.bf16.msrb.mxu0 %v1619_v4 }
  0xef   :  { %v1940_v7 = vld [vmem:[#allocation11 + $0xd4] sm:$0xf]  ;;  %v745_v4 = vperm.slane %v742_v52, 1  ;;  %v1961_v52 = vld [vmem:[#allocation13 + $0x74] sm:$0xf0] }
  0xf0   :  { %v323_v14 = vmul.f32 %v322_v10, %v311_v60  ;;  %v316_v15 = vmul.f32 %v315_v11, %v311_v60  ;;  %v1631_v60 = vor.u32 %v1926_v57, %v1628_v58  ;;  %v1683_v11 = vor.u32 %v1941_v3, %v1682_v2  ;;  %v1917_v57 = vld [vmem:[#allocation11 + $0x14] sm:$0xf0]  ;;  %v1650_v58 = vld [vmem:[#allocation11 + $0x90] sm:$0xf]  ;;  %v1932_v2 = vld [vmem:[#allocation11 + $0x94] sm:$0xf] }
  0xf1   :  { %v1652_v3 = vld [vmem:[#allocation11 + $0x98] sm:$0xf0] }
  0xf2   :  { %v324_v16 = vadd.f32 1.0, %v323_v14  ;;  %v317_v17 = vadd.f32 1.0, %v316_v15  ;;  %v1610_v14 = vld [vmem:[#allocation11 + $0x40] sm:$0xf]  ;;  %v1923_v15 = vld [vmem:[#allocation11 + $0x44] sm:$0xf0] }
  0xf3   :  { %v1611_v46 = vor.u32 %v1923_v15, %v1610_v14 }
  0xf4   :  { %v325_v22 = vmul.f32 %v324_v16, %v309_v56  ;;  %v333_v23 = vxor.u32 2147483648, %v317_v17  ;;  %v1943_v56 = vld [vmem:[#allocation11 + $0xe4] sm:$0xf0]  ;;  %v1623_v16 = vor.u32 %v1924_v5, %v1620_v6 }
  0xf5   :  { %v1691_v59 = vor.u32 %v1943_v56, %v1690_v54  ;;  %971 = vmatpush.bf16.msrb.mxu0 %v1611_v46  ;;  %v1586_v56 = vld [vmem:[#allocation11 + $0x10] sm:$0xf] }
  0xf6   :  { %v330_v24 = vxor.u32 2147483648, %v325_v22  ;;  %v334_v26 = vsel %vm332_vm2, %v333_v23, %v325_v22  ;;  %v489_v0 = vsel %vm487_vm7, %v333_v23, %v325_v22  ;;  %v1939_v22 = vld [vmem:[#allocation11 + $0xc4] sm:$0xf0]  ;;  %v1922_v23 = vld [vmem:[#allocation11 + $0x44] sm:$0xf]  ;;  %v1587_v5 = vor.u32 %v1917_v57, %v1586_v56 }
  0xf7   :  { %982 = vmatpush.bf16.msrb.mxu1 %v1691_v59  ;;  %v1754_v57 = vld [vmem:[#allocation13 + $0x60] sm:$0xf] }
  0xf8   :  { %v331_v25 = vsel %vm329_vm1, %v317_v17, %v330_v24  ;;  %v486_v18 = vsel %vm484_vm6, %v317_v17, %v330_v24  ;;  %v1687_v17 = vor.u32 %v1940_v7, %v1684_v12  ;;  %v1612_v24 = vld [vmem:[#allocation11 + $0x48] sm:$0xf0]  ;;  %v1915_v12 = vld [vmem:[#allocation11 + $0x4] sm:$0xf0] }
  0xf9   :  { %v335_v27 = vsel %vm328_vm3, %v331_v25, %v334_v26  ;;  %v490_v21 = vsel %vm483_vm8, %v486_v18, %v489_v0  ;;  %v1938_v25 = vld [vmem:[#allocation11 + $0xc4] sm:$0xf]  ;;  %v1676_v26 = vld [vmem:[#allocation11 + $0xc8] sm:$0xf0]  ;;  %v1615_v30 = vor.u32 %v1922_v23, %v1612_v24  ;;  %v1666_v0 = vld [vmem:[#allocation11 + $0xb0] sm:$0xf] }
  0xfa   :  { %v336_v28 = vsel %vm326_vm4, nan, %v335_v27  ;;  %v491_v33 = vsel %vm326_vm4, nan, %v490_v21  ;;  %v1675_v27 = vor.u32 %v1939_v22, %v1674_v19  ;;  %v1679_v18 = vor.u32 %v1938_v25, %v1676_v26  ;;  %v1937_v21 = vld [vmem:[#allocation11 + $0xb4] sm:$0xf0]  ;;  %v1931_v19 = vld [vmem:[#allocation11 + $0x84] sm:$0xf0] }
  0xfb   :  { %v581_v29 = vpack.c.bf16 %v336_v28, %v336_v28  ;;  %v662_v31 = vpack.c.bf16 %v491_v33, %v491_v33  ;;  %983 = vmatpush.bf16.msrb.mxu1 %v1683_v11  ;;  %v1602_v28 = vld [vmem:[#allocation11 + $0x30] sm:$0xf]  ;;  %v1920_v33 = vld [vmem:[#allocation11 + $0x34] sm:$0xf]  ;;  %v1667_v41 = vor.u32 %v1937_v21, %v1666_v0  ;;  %v1578_v11 = vld [vmem:[#allocation11] sm:$0xf] }
  0xfc   :  { %v1580_v22 = vld [vmem:[#allocation11 + $0x8] sm:$0xf0]  ;;  %v1579_v26 = vor.u32 %v1915_v12, %v1578_v11  ;;  %v1975_v11 = vld [vmem:[#allocation13 + $0xe4] sm:$0xf0]  ;;  %v1974_v12 = vld [vmem:[#allocation13 + $0xe4] sm:$0xf] }
  0xfd   :  { %1540 = vmatmul.msk.bf16.vlgmr.msrb.gmra.mxu2 %vm630_vm5, %v581_v29  ;;  %1541 = vmatmul.msk.bf16.vlgmr.msrb.gmra.mxu3 %vm630_vm5, %v581_v29  ;;  %v1921_v29 = vld [vmem:[#allocation11 + $0x34] sm:$0xf0]  ;;  %v1644_v23 = vld [vmem:[#allocation11 + $0x88] sm:$0xf0] }
  0xfe   :  { %994 = vmatpush.bf16.msrb.mxu2 %v1639_v50  ;;  %1007 = vmatpush.bf16.msrb.mxu3 %v1703_v51  ;;  %v1934_v50 = vld [vmem:[#allocation11 + $0xa4] sm:$0xf]  ;;  %v1660_v51 = vld [vmem:[#allocation11 + $0xa8] sm:$0xf0] }
  0xff   :  { %984 = vmatpush.bf16.msrb.mxu1 %v1675_v27  ;;  %v1663_v61 = vor.u32 %v1934_v50, %v1660_v51  ;;  %v1762_v51 = vld [vmem:[#allocation13 + $0x70] sm:$0xf] }
 0x102   :  { %995 = vmatpush.bf16.msrb.mxu2 %v1631_v60  ;;  %1008 = vmatpush.bf16.msrb.mxu3 %v1695_v63  ;;  %v1599_v60 = vor.u32 %v1918_v48, %v1596_v49  ;;  %v1588_v63 = vld [vmem:[#allocation11 + $0x18] sm:$0xf0] }
 0x103   :  { %985 = vmatpush.bf16.msrb.mxu1 %v1667_v41 }
 0x106   :  { %996 = vmatpush.bf16.msrb.mxu2 %v1623_v16  ;;  %1009 = vmatpush.bf16.msrb.mxu3 %v1687_v17  ;;  %v1655_v16 = vor.u32 %v1932_v2, %v1652_v3  ;;  %v1642_v17 = vld [vmem:[#allocation11 + $0x80] sm:$0xf]  ;;  %v1828_v3 = vld [vmem:[#allocation13 + $0xf8] sm:$0xf0] }
 0x107   :  { %986 = vmatpush.bf16.msrb.mxu1 %v1659_v55  ;;  %v1643_v46 = vor.u32 %v1931_v19, %v1642_v17  ;;  %v1764_v55 = vld [vmem:[#allocation13 + $0x78] sm:$0xf0]  ;;  %v1738_v17 = vld [vmem:[#allocation13 + $0x40] sm:$0xf]  ;;  %v1955_v19 = vld [vmem:[#allocation13 + $0x44] sm:$0xf0] }
 0x10a   :  { %997 = vmatpush.bf16.msrb.mxu2 %v1615_v30  ;;  %1010 = vmatpush.bf16.msrb.mxu3 %v1679_v18 }
 0x10d   :  { %1574 = vmatmul.msk.bf16.vlgmr.msra.gmra.mxu2 %vm630_vm5, %v662_v31  ;;  %1575 = vmatmul.msk.bf16.vlgmr.msra.gmra.mxu3 %vm630_vm5, %v662_v31  ;;  %v1604_v31 = vld [vmem:[#allocation11 + $0x38] sm:$0xf0] }
 0x10e   :  { %v1607_v44 = vor.u32 %v1920_v33, %v1604_v31 }
 0x110   :  { %998 = vmatpush.bf16.msrb.mxu2 %v1607_v44 }
 0x114   :  { %999 = vmatpush.bf16.msrb.mxu2 %v1599_v60  ;;  %v1958_v60 = vld [vmem:[#allocation13 + $0x64] sm:$0xf] }
 0x138   :  { %v2498_v32 = vpop.f32.mrf.mxu2 }
 0x139   :  { %v2500_v9 = vpop.f32.mrf.mxu3 }
 0x13a   :  { %v2502_v35 = vpop.f32.mrf.mxu0 }
 0x13b   :  { %v565_v54 = vadd.f32 %v2498_v32, %v2502_v35 }
 0x13c   :  { %v2504_v37 = vpop.f32.mrf.mxu1 }
 0x13d   :  { %v578_v59 = vadd.f32 %v2500_v9, %v2504_v37  ;;  %v1651_v9 = vor.u32 %v1933_v62, %v1650_v58  ;;  %v1591_v37 = vor.u32 %v1916_v13, %v1588_v63  ;;  %v1959_v58 = vld [vmem:[#allocation13 + $0x64] sm:$0xf0]  ;;  %v1826_v13 = vld [vmem:[#allocation13 + $0xf0] sm:$0xf]  ;;  %v1977_v63 = vld [vmem:[#allocation13 + $0xf4] sm:$0xf0] }
 0x13e   :  { %v1827_v2 = vor.u32 %v1977_v63, %v1826_v13  ;;  %v1786_v63 = vld [vmem:[#allocation13 + $0xa0] sm:$0xf] }
 0x13f   :  { %987 = vmatpush.bf16.msrb.mxu1 %v1651_v9  ;;  %1000 = vmatpush.bf16.msrb.mxu2 %v1591_v37  ;;  %v1818_v37 = vld [vmem:[#allocation13 + $0xe0] sm:$0xf] }
 0x140   :  { %v566_v34 = vpop.f32.mrf.mxu2 }
 0x141   :  { %v579_v36 = vpop.f32.mrf.mxu3  ;;  %v1936_v34 = vld [vmem:[#allocation11 + $0xb4] sm:$0xf] }
 0x142   :  { %v524_v38 = vpop.f32.mrf.mxu0  ;;  %v1668_v36 = vld [vmem:[#allocation11 + $0xb8] sm:$0xf0] }
 0x143   :  { %v1603_v38 = vor.u32 %v1921_v29, %v1602_v28  ;;  %v1671_v45 = vor.u32 %v1936_v34, %v1668_v36  ;;  %988 = vmatpush.bf16.msrb.mxu1 %v1643_v46 }
 0x144   :  { %v537_v39 = vpop.f32.mrf.mxu1 }
 0x145   :  { %972 = vmatpush.bf16.msrb.mxu0 %v1603_v38  ;;  %1011 = vmatpush.bf16.msrb.mxu3 %v1671_v45 }
 0x147   :  { %1251 = vmatpush.bf16.msra.mxu1 %v1827_v2  ;;  %v1966_v2 = vld [vmem:[#allocation13 + $0xa4] sm:$0xf] }
 0x149   :  { %973 = vmatpush.bf16.msrb.mxu0 %v1595_v53  ;;  %1012 = vmatpush.bf16.msrb.mxu3 %v1663_v61  ;;  %v1960_v53 = vld [vmem:[#allocation13 + $0x74] sm:$0xf]  ;;  %v1756_v61 = vld [vmem:[#allocation13 + $0x68] sm:$0xf0] }
 0x14a   :  { %v1767_v56 = vor.u32 %v1960_v53, %v1764_v55  ;;  %v1759_v62 = vor.u32 %v1958_v60, %v1756_v61  ;;  %v1796_v53 = vld [vmem:[#allocation13 + $0xb8] sm:$0xf0] }
 0x14d   :  { %974 = vmatpush.bf16.msrb.mxu0 %v1587_v5  ;;  %1013 = vmatpush.bf16.msrb.mxu3 %v1655_v16  ;;  %v1956_v5 = vld [vmem:[#allocation13 + $0x54] sm:$0xf] }
 0x151   :  { %975 = vmatpush.bf16.msrb.mxu0 %v1579_v26  ;;  %v1972_v26 = vld [vmem:[#allocation13 + $0xd4] sm:$0xf] }
 0x180   :  { %v2506_v8 = vpop.f32.mrf.mxu2  ;;  %v2508_v10 = vpop.f32.mrf.mxu3 }
 0x181   :  { %v660_v32 = vadd.f32 %v2506_v8, %v565_v54  ;;  %v661_v35 = vadd.f32 %v2508_v10, %v578_v59  ;;  %v1914_v8 = vld [vmem:[#allocation11 + $0x4] sm:$0xf]  ;;  %v1763_v54 = vor.u32 %v1961_v52, %v1762_v51  ;;  %v1755_v59 = vor.u32 %v1959_v58, %v1754_v57  ;;  %v1968_v51 = vld [vmem:[#allocation13 + $0xb4] sm:$0xf]  ;;  %v1949_v57 = vld [vmem:[#allocation13 + $0x14] sm:$0xf0] }
 0x182   :  { %v1930_v10 = vld [vmem:[#allocation11 + $0x84] sm:$0xf]  ;;  %v1583_v29 = vor.u32 %v1914_v8, %v1580_v22  ;;  %v1739_v22 = vor.u32 %v1955_v19, %v1738_v17  ;;  %v1799_v55 = vor.u32 %v1968_v51, %v1796_v53  ;;  %v1948_v58 = vld [vmem:[#allocation13 + $0x14] sm:$0xf]  ;;  %v1965_v17 = vld [vmem:[#allocation13 + $0x94] sm:$0xf0] }
 0x183   :  { %v1647_v30 = vor.u32 %v1930_v10, %v1644_v23  ;;  %1238 = vmatpush.bf16.msra.mxu0 %v1763_v54  ;;  %v1954_v8 = vld [vmem:[#allocation13 + $0x44] sm:$0xf]  ;;  %v1740_v10 = vld [vmem:[#allocation13 + $0x48] sm:$0xf0]  ;;  %v1964_v19 = vld [vmem:[#allocation13 + $0x94] sm:$0xf] }
 0x184   :  { %1001 = vmatpush.bf16.msrb.mxu2 %v1583_v29  ;;  %v1743_v23 = vor.u32 %v1954_v8, %v1740_v10  ;;  %v1730_v29 = vld [vmem:[#allocation13 + $0x30] sm:$0xf] }
 0x185   :  { %1014 = vmatpush.bf16.msrb.mxu3 %v1647_v30  ;;  %v1953_v30 = vld [vmem:[#allocation13 + $0x34] sm:$0xf0] }
 0x187   :  { %1239 = vmatpush.bf16.msra.mxu0 %v1755_v59 }
 0x188   :  { %v645_v39 = vpop.f32.mrf.mxu2  ;;  %v658_v40 = vpop.f32.mrf.mxu3  ;;  %1264 = vmatpush.bf16.msra.mxu2 %v1767_v56  ;;  %v1714_v56 = vld [vmem:[#allocation13 + $0x10] sm:$0xf] }
 0x189   :  { %v1715_v61 = vor.u32 %v1949_v57, %v1714_v56  ;;  %v1993_v56 = vld [vmem:[#allocation14 + $0x78] sm:$0xff]  ;;  %v1983_v57 = vld [vmem:[#allocation14 + $0x28] sm:$0xff] }
 0x18c   :  { %1265 = vmatpush.bf16.msra.mxu2 %v1759_v62  ;;  %v1716_v62 = vld [vmem:[#allocation13 + $0x18] sm:$0xf0] }
 0x18d   :  { %v1719_v13 = vor.u32 %v1948_v58, %v1716_v62  ;;  %v1992_v58 = vld [vmem:[#allocation14 + $0x70] sm:$0xff]  ;;  %v1072_v62 = vld [vmem:[%s2546_s11] sm:$0x3] }
 0x190   :  { %v723_v6 = vpop.f32.mrf.mxu2  ;;  %v736_v7 = vpop.f32.mrf.mxu3 }
 0x191   :  { %v740_v14 = vadd.f32 %v723_v6, %v660_v32  ;;  %v741_v15 = vadd.f32 %v736_v7, %v661_v35  ;;  %v1746_v35 = vld [vmem:[#allocation13 + $0x50] sm:$0xf]  ;;  %v1748_v7 = vld [vmem:[#allocation13 + $0x58] sm:$0xf0] }
 0x192   :  { %v1751_v9 = vor.u32 %v1956_v5, %v1748_v7  ;;  %v1947_v7 = vld [vmem:[#allocation13 + $0x4] sm:$0xf0] }
 0x193   :  { %v748_v24 = vadd.f32 %v744_v1, %v740_v14  ;;  %v749_v25 = vadd.f32 %v745_v4, %v741_v15  ;;  %v1976_v1 = vld [vmem:[#allocation13 + $0xf4] sm:$0xf]  ;;  %v1957_v4 = vld [vmem:[#allocation13 + $0x54] sm:$0xf0]  ;;  %v1819_v14 = vor.u32 %v1975_v11, %v1818_v37  ;;  %v1820_v15 = vld [vmem:[#allocation13 + $0xe8] sm:$0xf0] }
 0x194   :  { %v1831_v32 = vor.u32 %v1976_v1, %v1828_v3  ;;  %v1747_v6 = vor.u32 %v1957_v4, %v1746_v35  ;;  %1266 = vmatpush.bf16.msra.mxu2 %v1751_v9  ;;  %v1823_v16 = vor.u32 %v1974_v12, %v1820_v15  ;;  %v1967_v1 = vld [vmem:[#allocation13 + $0xa4] sm:$0xf0]  ;;  %v1788_v4 = vld [vmem:[#allocation13 + $0xa8] sm:$0xf0]  ;;  %v1946_v9 = vld [vmem:[#allocation13 + $0x4] sm:$0xf] }
 0x195   :  { %v750_v27 = vmin.f32 %v748_v24, 30.0  ;;  %v751_v28 = vmin.f32 %v749_v25, 30.0  ;;  %1252 = vmatpush.bf16.msra.mxu1 %v1819_v14  ;;  %v1787_v35 = vor.u32 %v1967_v1, %v1786_v63  ;;  %v1791_v5 = vor.u32 %v1966_v2, %v1788_v4  ;;  %v1708_v12 = vld [vmem:[#allocation13 + $0x8] sm:$0xf0]  ;;  %v1980_v2 = vld [vmem:[#allocation14 + $0x10] sm:$0xff] }
 0x196   :  { %1277 = vmatpush.bf16.msra.mxu3 %v1831_v32  ;;  %1240 = vmatpush.bf16.msra.mxu0 %v1747_v6  ;;  %v1706_v6 = vld [vmem:[#allocation13] sm:$0xf]  ;;  %v1711_v15 = vor.u32 %v1946_v9, %v1708_v12  ;;  %v1074_v1 = vperm.slane %v1072_v62, 0  ;;  %v1988_v9 = vld [vmem:[#allocation14 + $0x50] sm:$0xff] }
 0x197   :  { %v752_v18 = vmul.f32 1.442695, %v750_v27  ;;  %v754_v0 = vmul.f32 1.442695, %v751_v28  ;;  %v1812_v27 = vld [vmem:[#allocation13 + $0xd8] sm:$0xf0]  ;;  %v1707_v11 = vor.u32 %v1947_v7, %v1706_v6 }
 0x198   :  { %v725_v21 = vpop.f32.mrf.mxu2  ;;  %v738_v33 = vpop.f32.mrf.mxu3  ;;  %1267 = vmatpush.bf16.msra.mxu2 %v1743_v23  ;;  %v1815_v28 = vor.u32 %v1972_v26, %v1812_v27  ;;  %v1963_v27 = vld [vmem:[#allocation13 + $0x84] sm:$0xf0]  ;;  %v1075_v7 = vperm.slane %v1072_v62, 1  ;;  %v1978_v12 = vld [vmem:[#allocation14] sm:$0xff] }
 0x199   :  { %2018 = vpow2.f32 %v752_v18  ;;  %v1952_v18 = vld [vmem:[#allocation13 + $0x34] sm:$0xf]  ;;  %v1731_v21 = vor.u32 %v1953_v30, %v1730_v29  ;;  %v1732_v33 = vld [vmem:[#allocation13 + $0x38] sm:$0xf0]  ;;  %v1772_v29 = vld [vmem:[#allocation13 + $0x88] sm:$0xf0] }
 0x19a   :  { %2020 = vpow2.f32 %v754_v0  ;;  %1278 = vmatpush.bf16.msra.mxu3 %v1823_v16  ;;  %1241 = vmatpush.bf16.msra.mxu0 %v1739_v22  ;;  %v2522_v0 = vld [vmem:[%s2544_s9] sm:$0x3]  ;;  %v1778_v16 = vld [vmem:[#allocation13 + $0x90] sm:$0xf] }
 0x19b   :  { %v805_v32 = vperm.slane %v2522_v0, 1  ;;  %v1779_v23 = vor.u32 %v1965_v17, %v1778_v16  ;;  %v1987_v16 = vld [vmem:[#allocation14 + $0x48] sm:$0xff] }
 0x19e   :  { %1279 = vmatpush.bf16.msra.mxu3 %v1815_v28  ;;  %1242 = vmatpush.bf16.msra.mxu0 %v1731_v21  ;;  %v1962_v28 = vld [vmem:[#allocation13 + $0x84] sm:$0xf] }
 0x19f   :  { %v2019_v31 = vpop.eup %2018  ;;  %v1775_v21 = vor.u32 %v1962_v28, %v1772_v29 }
 0x1a0   :  { %v2021_v34 = vpop.eup %2020  ;;  %v756_v36 = vadd.f32 2.0, %v2019_v31 }
 0x1a1   :  { %v757_v38 = vadd.f32 2.0, %v2021_v34 }
 0x1a2   :  { %v758_v39 = vmul.f32 %v2019_v31, %v756_v36  ;;  %v1735_v31 = vor.u32 %v1952_v18, %v1732_v33  ;;  %v1971_v36 = vld [vmem:[#allocation13 + $0xc4] sm:$0xf0] }
 0x1a3   :  { %v759_v40 = vmul.f32 %v2021_v34, %v757_v38  ;;  %v1802_v34 = vld [vmem:[#allocation13 + $0xc0] sm:$0xf]  ;;  %v1970_v38 = vld [vmem:[#allocation13 + $0xc4] sm:$0xf] }
 0x1a4   :  { %v760_v41 = vadd.f32 2.0, %v758_v39  ;;  %1268 = vmatpush.bf16.msra.mxu2 %v1735_v31 }
 0x1a5   :  { %v761_v20 = vadd.f32 2.0, %v759_v40 }
 0x1a6   :  { %2022 = vrcp.f32 %v760_v41 }
 0x1a7   :  { %2024 = vrcp.f32 %v761_v20  ;;  %v1722_v20 = vld [vmem:[#allocation13 + $0x20] sm:$0xf] }
 0x1ac   :  { %v2023_v43 = vpop.eup %2022 }
 0x1ad   :  { %v2025_v44 = vpop.eup %2024  ;;  %v764_v45 = vmul.f32 %v2023_v43, %v758_v39  ;;  %v1803_v39 = vor.u32 %v1971_v36, %v1802_v34  ;;  %v1951_v43 = vld [vmem:[#allocation13 + $0x24] sm:$0xf0] }
 0x1ae   :  { %v765_v42 = vmul.f32 %v2025_v44, %v759_v40  ;;  %v1804_v40 = vld [vmem:[#allocation13 + $0xc8] sm:$0xf0]  ;;  %v1950_v44 = vld [vmem:[#allocation13 + $0x24] sm:$0xf] }
 0x1af   :  { %v766_v47 = vmul.f32 %v764_v45, %v748_v24  ;;  %v1810_v24 = vld [vmem:[#allocation13 + $0xd0] sm:$0xf]  ;;  %v1807_v41 = vor.u32 %v1970_v38, %v1804_v40  ;;  %v804_v45 = vperm.slane %v2522_v0, 0 }
 0x1b0   :  { %v767_v48 = vmul.f32 %v765_v42, %v749_v25  ;;  %v1973_v25 = vld [vmem:[#allocation13 + $0xd4] sm:$0xf0]  ;;  %v1723_v42 = vor.u32 %v1951_v43, %v1722_v20 }
 0x1b1   :  { %v768_v49 = vpack.c.bf16 %v766_v47, %v766_v47  ;;  %v1811_v46 = vor.u32 %v1973_v25, %v1810_v24  ;;  %v1724_v47 = vld [vmem:[#allocation13 + $0x28] sm:$0xf0]  ;;  %1280 = vmatpush.bf16.msra.mxu3 %v1807_v41  ;;  %v1780_v24 = vld [vmem:[#allocation13 + $0x98] sm:$0xf0]  ;;  %v1770_v25 = vld [vmem:[#allocation13 + $0x80] sm:$0xf] }
 0x1b2   :  { %v769_v50 = vpack.c.bf16 %v767_v48, %v767_v48  ;;  %v1727_v48 = vor.u32 %v1950_v44, %v1724_v47  ;;  %1243 = vmatpush.bf16.msra.mxu0 %v1723_v42  ;;  %v1771_v0 = vor.u32 %v1963_v27, %v1770_v25 }
 0x1b3   :  { %976 = vmatmul.bf16.vlgmr.msrb.gmra.mxu0 %v768_v49  ;;  %1002 = vmatmul.bf16.vlgmr.msrb.gmra.mxu2 %v768_v49  ;;  %v1794_v49 = vld [vmem:[#allocation13 + $0xb0] sm:$0xf] }
 0x1b4   :  { %989 = vmatmul.bf16.vlgmr.msrb.gmra.mxu1 %v769_v50  ;;  %1015 = vmatmul.bf16.vlgmr.msrb.gmra.mxu3 %v769_v50  ;;  %v1969_v50 = vld [vmem:[#allocation13 + $0xb4] sm:$0xf0] }
 0x1b5   :  { %1253 = vmatpush.bf16.msra.mxu1 %v1811_v46  ;;  %v1795_v52 = vor.u32 %v1969_v50, %v1794_v49  ;;  %1269 = vmatpush.bf16.msra.mxu2 %v1727_v48  ;;  %v1783_v46 = vor.u32 %v1964_v19, %v1780_v24 }
 0x1b6   :  { %1281 = vmatpush.bf16.msra.mxu3 %v1799_v55  ;;  %1244 = vmatpush.bf16.msra.mxu0 %v1715_v61  ;;  %v1984_v55 = vld [vmem:[#allocation14 + $0x30] sm:$0xff]  ;;  %v1981_v61 = vld [vmem:[#allocation14 + $0x18] sm:$0xff] }
 0x1b9   :  { %1254 = vmatpush.bf16.msra.mxu1 %v1803_v39  ;;  %1270 = vmatpush.bf16.msra.mxu2 %v1719_v13  ;;  %v1990_v13 = vld [vmem:[#allocation14 + $0x60] sm:$0xff] }
 0x1ba   :  { %1282 = vmatpush.bf16.msra.mxu3 %v1791_v5  ;;  %1245 = vmatpush.bf16.msra.mxu0 %v1707_v11 }
 0x1bd   :  { %1255 = vmatpush.bf16.msra.mxu1 %v1795_v52  ;;  %1271 = vmatpush.bf16.msra.mxu2 %v1711_v15 }
 0x1be   :  { %1283 = vmatpush.bf16.msra.mxu3 %v1783_v46 }
 0x1c1   :  { %1256 = vmatpush.bf16.msra.mxu1 %v1787_v35  ;;  %v1979_v35 = vld [vmem:[#allocation14 + $0x8] sm:$0xff] }
 0x1c2   :  { %1284 = vmatpush.bf16.msra.mxu3 %v1775_v21 }
 0x1c5   :  { %1257 = vmatpush.bf16.msra.mxu1 %v1779_v23 }
 0x1c9   :  { %1258 = vmatpush.bf16.msra.mxu1 %v1771_v0 }
 0x1cd   :  { %1455 = vmatpush.bf16.msrb.mxu1 %v1993_v56 }
 0x1d1   :  { %1456 = vmatpush.bf16.msrb.mxu1 %v1992_v58 }
 0x230   :  { %v977_v54 = vpop.f32.mrf.mxu0 }
 0x231   :  { %v978_v59 = vadd.f32 %v977_v54, %v804_v45  ;;  %v990_v60 = vpop.f32.mrf.mxu1  ;;  %v1985_v54 = vld [vmem:[#allocation14 + $0x38] sm:$0xff] }
 0x232   :  { %1442 = vmatpush.bf16.msrb.mxu0 %v1985_v54 }
 0x233   :  { %v991_v3 = vadd.f32 %v990_v60, %v978_v59  ;;  %v1982_v59 = vld [vmem:[#allocation14 + $0x20] sm:$0xff]  ;;  %v1991_v60 = vld [vmem:[#allocation14 + $0x68] sm:$0xff] }
 0x234   :  { %1457 = vmatpush.bf16.msrb.mxu1 %v1991_v60 }
 0x235   :  { %v1020_v37 = vmin.f32 %v991_v3, 30.0 }
 0x236   :  { %v1003_v14 = vpop.f32.mrf.mxu2  ;;  %1443 = vmatpush.bf16.msrb.mxu0 %v1984_v55 }
 0x237   :  { %v1022_v8 = vmul.f32 1.442695, %v1020_v37  ;;  %v1004_v22 = vadd.f32 %v1003_v14, %v805_v32  ;;  %v1016_v10 = vpop.f32.mrf.mxu3 }
 0x238   :  { %v979_v26 = vpop.f32.mrf.mxu0  ;;  %1458 = vmatpush.bf16.msrb.mxu1 %v1990_v13 }
 0x239   :  { %2026 = vpow2.f32 %v1022_v8  ;;  %v1017_v30 = vadd.f32 %v1016_v10, %v1004_v22  ;;  %v992_v18 = vpop.f32.mrf.mxu1  ;;  %v1986_v8 = vld [vmem:[#allocation14 + $0x40] sm:$0xff] }
 0x23a   :  { %1444 = vmatpush.bf16.msrb.mxu0 %v1983_v57 }
 0x23b   :  { %v1021_v33 = vmin.f32 %v1017_v30, 30.0 }
 0x23d   :  { %v1024_v31 = vmul.f32 1.442695, %v1021_v33 }
 0x23e   :  { %v1005_v34 = vpop.f32.mrf.mxu2  ;;  %1445 = vmatpush.bf16.msrb.mxu0 %v1982_v59 }
 0x23f   :  { %v2027_v36 = vpop.eup %2026  ;;  %2028 = vpow2.f32 %v1024_v31  ;;  %v1018_v38 = vpop.f32.mrf.mxu3 }
 0x240   :  { %v1026_v39 = vadd.f32 2.0, %v2027_v36 }
 0x242   :  { %v1028_v40 = vmul.f32 %v2027_v36, %v1026_v39  ;;  %1446 = vmatpush.bf16.msrb.mxu0 %v1981_v61 }
 0x244   :  { %v1030_v41 = vadd.f32 2.0, %v1028_v40 }
 0x245   :  { %v2029_v20 = vpop.eup %2028 }
 0x246   :  { %2030 = vrcp.f32 %v1030_v41  ;;  %v1027_v43 = vadd.f32 2.0, %v2029_v20  ;;  %1447 = vmatpush.bf16.msrb.mxu0 %v1980_v2 }
 0x248   :  { %v1029_v44 = vmul.f32 %v2029_v20, %v1027_v43  ;;  %v2015_v20 = vld [vmem:[%s2548_s13] ss:$0 sm:$0xff] }
 0x24a   :  { %v1031_v45 = vadd.f32 2.0, %v1029_v44  ;;  %1448 = vmatpush.bf16.msrb.mxu0 %v1979_v35 }
 0x24c   :  { %v2031_v42 = vpop.eup %2030  ;;  %2032 = vrcp.f32 %v1031_v45 }
 0x24d   :  { %v1034_v47 = vmul.f32 %v2031_v42, %v1028_v40 }
 0x24e   :  { %1449 = vmatpush.bf16.msrb.mxu0 %v1978_v12 }
 0x24f   :  { %v1036_v48 = vmul.f32 %v1034_v47, %v991_v3  ;;  %v1989_v3 = vld [vmem:[#allocation14 + $0x58] sm:$0xff] }
 0x250   :  { %1459 = vmatpush.bf16.msrb.mxu1 %v1989_v3 }
 0x251   :  { %v1038_v49 = vpack.c.bf16 %v1036_v48, %v1036_v48 }
 0x252   :  { %v2033_v50 = vpop.eup %2032 }
 0x253   :  { %v1035_v51 = vmul.f32 %v2033_v50, %v1029_v44  ;;  %1246 = vmatmul.bf16.vlgmr.msra.gmra.mxu0 %v1038_v49  ;;  %1272 = vmatmul.bf16.vlgmr.msra.gmra.mxu2 %v1038_v49 }
 0x254   :  { %1460 = vmatpush.bf16.msrb.mxu1 %v1988_v9 }
 0x255   :  { %v1037_v52 = vmul.f32 %v1035_v51, %v1017_v30 }
 0x257   :  { %v1039_v53 = vpack.c.bf16 %v1037_v52, %v1037_v52 }
 0x258   :  { %1461 = vmatpush.bf16.msrb.mxu1 %v1987_v16 }
 0x259   :  { %1259 = vmatmul.bf16.vlgmr.msra.gmra.mxu1 %v1039_v53  ;;  %1285 = vmatmul.bf16.vlgmr.msra.gmra.mxu3 %v1039_v53 }
 0x25c   :  { %1462 = vmatpush.bf16.msrb.mxu1 %v1986_v8 }
 0x2d0   :  { %v1247_v63 = vpop.f32.mrf.mxu0 }
 0x2d1   :  { %v1248_v32 = vadd.f32 %v1247_v63, %v1074_v1 }
 0x2d6   :  { %v1260_v4 = vpop.f32.mrf.mxu1  ;;  %v1273_v5 = vpop.f32.mrf.mxu2 }
 0x2d7   :  { %v1261_v6 = vadd.f32 %v1260_v4, %v1248_v32  ;;  %v1274_v15 = vadd.f32 %v1273_v5, %v1075_v7 }
 0x2d8   :  { %v1249_v37 = vpop.f32.mrf.mxu0 }
 0x2d9   :  { %v1290_v11 = vmin.f32 %v1261_v6, 30.0 }
 0x2db   :  { %v1292_v14 = vmul.f32 1.442695, %v1290_v11 }
 0x2dc   :  { %v1286_v17 = vpop.f32.mrf.mxu3 }
 0x2dd   :  { %2034 = vpow2.f32 %v1292_v14  ;;  %v1287_v19 = vadd.f32 %v1286_v17, %v1274_v15 }
 0x2de   :  { %v1262_v22 = vpop.f32.mrf.mxu1  ;;  %v1275_v10 = vpop.f32.mrf.mxu2 }
 0x2df   :  { %v1291_v23 = vmin.f32 %v1287_v19, 30.0 }
 0x2e1   :  { %v1294_v24 = vmul.f32 1.442695, %v1291_v23 }
 0x2e3   :  { %v2035_v25 = vpop.eup %2034  ;;  %2036 = vpow2.f32 %v1294_v24 }
 0x2e4   :  { %v1296_v26 = vadd.f32 2.0, %v2035_v25  ;;  %v1288_v46 = vpop.f32.mrf.mxu3 }
 0x2e6   :  { %v1298_v27 = vmul.f32 %v2035_v25, %v1296_v26 }
 0x2e8   :  { %v1300_v28 = vadd.f32 2.0, %v1298_v27 }
 0x2e9   :  { %v2037_v29 = vpop.eup %2036 }
 0x2ea   :  { %2038 = vrcp.f32 %v1300_v28  ;;  %v1297_v30 = vadd.f32 2.0, %v2037_v29 }
 0x2ec   :  { %v1299_v18 = vmul.f32 %v2037_v29, %v1297_v30 }
 0x2ee   :  { %v1301_v0 = vadd.f32 2.0, %v1299_v18 }
 0x2f0   :  { %v2039_v21 = vpop.eup %2038  ;;  %2040 = vrcp.f32 %v1301_v0 }
 0x2f1   :  { %v1304_v33 = vmul.f32 %v2039_v21, %v1298_v27 }
 0x2f3   :  { %v1306_v31 = vmul.f32 %v1304_v33, %v1261_v6 }
 0x2f5   :  { %v1308_v34 = vpack.c.bf16 %v1306_v31, %v1306_v31 }
 0x2f6   :  { %v2041_v36 = vpop.eup %2040 }
 0x2f7   :  { %v1305_v38 = vmul.f32 %v2041_v36, %v1299_v18  ;;  %1450 = vmatmul.bf16.vlgmr.msrb.gmra.mxu0 %v1308_v34 }
 0x2f9   :  { %v1307_v39 = vmul.f32 %v1305_v38, %v1287_v19 }
 0x2fb   :  { %v1309_v40 = vpack.c.bf16 %v1307_v39, %v1307_v39 }
 0x2fd   :  { %1463 = vmatmul.bf16.vlgmr.msrb.gmra.mxu1 %v1309_v40 }
 0x374   :  { %v1451_v41 = vpop.f32.mrf.mxu0 }
 0x375   :  { %v1452_v43 = vadd.f32 %v2015_v20, %v1451_v41 }
 0x37a   :  { %v1464_v44 = vpop.f32.mrf.mxu1 }
 0x37b   :  { %v1465_v45 = vadd.f32 %v1464_v44, %v1452_v43 }
 0x37c   :  { %v1453_v42 = vpop.f32.mrf.mxu0 }
 0x37d   :  { %1468 = vst [vmem:[#allocation16] sm:$0xff] %v1465_v45 }
 0x37e   :  { %1479 = dma.vmem_to_hbm [thread:$0]  %s1475_s21, 128, %s1477_s24, [#allocation4]  }
 0x382   :  { %v1466_v47 = vpop.f32.mrf.mxu1 }
 0x383   :  { %2268 = dma.done.wait [#allocation4], 128  }
 0x384   :  { %2269 = vsyncadd [#allocation4], 4294967168 }
 0x385   :  { %1484 = vsyncpa [#allocation3], 1 }
 0x386   :  { %1485 = vsyncpa [#allocation6], 1 }
 0x387   :  { %1486 = vsyncpa [#allocation9], 1 }
 0x388   :  { %1487 = vsyncpa [#allocation12], 1 }
 0x389   :  { %1488 = vsyncpa [#allocation15], 1 }
 0x38a   :  { %1489 = vsyncpa [#allocation4], 1 }

</bundles_post_ra>
